<compile_context>
chip_gen: v7x
topology: tpu7x:2x2x1
jax: 0.10.0
libtpu: 0.0.40
codegen_flags: <defaults>
</compile_context>

<pallas_src>
import jax
import jax.numpy as jnp
from jax.experimental import pallas as pl
from jax.experimental.pallas import tpu as pltpu


def _round_up(x, m):
    return ((x + m - 1) // m) * m


def _output_layer_kernel(x_ref, w_ref, b_ref, miu_ref, pi_ref, theta_ref):
    # Single fused MXU matmul over the concatenated (H, 3*O) weight slab.
    z = jnp.dot(x_ref[...], w_ref[...], preferred_element_type=jnp.float32)
    z = z + b_ref[...].astype(jnp.float32)

    o = miu_ref.shape[1]                       # static per-head width
    zm = z[:, :o]
    zp = z[:, o:2 * o]
    zt = z[:, 2 * o:3 * o]

    miu_ref[...] = jnp.exp(zm).astype(miu_ref.dtype)
    # sigmoid(x) == 0.5 * tanh(x / 2) + 0.5  -> one EUP op, no full-precision divide.
    pi_ref[...] = (0.5 * jnp.tanh(0.5 * zp) + 0.5).astype(pi_ref.dtype)
    theta_ref[...] = jnp.exp(zt).astype(theta_ref.dtype)


def output_layer(x, wm, bm, wp, bp, wt, bt, *, block_b=512, weight_dtype=None):
    """x: (B, H); w*: (H, O) (transposed PyTorch weights); b*: (1, O).

    Returns (Miu, Pi, Theta), each (B, O), matching OutputLayer.forward.
    `weight_dtype=jnp.bfloat16` enables bf16 weight/activation streaming
    (f32 MXU accumulation is kept via preferred_element_type).
    """
    B, H = x.shape
    O = wm.shape[1]
    out_dtype = x.dtype

    # --- Fuse the three heads into one weight / bias slab (wrapper-side). ---
    w_cat = jnp.concatenate([wm, wp, wt], axis=1)      # (H, 3*O)
    b_cat = jnp.concatenate([bm, bp, bt], axis=1)      # (1, 3*O)
    if weight_dtype is not None:
        w_cat = w_cat.astype(weight_dtype)
        x = x.astype(weight_dtype)

    # --- Batch tiling: weights resident, x / outputs pipelined over B. ---
    tb = min(block_b, _round_up(B, 8))                 # sublane-aligned tile
    Bp = _round_up(B, tb)
    if Bp != B:
        x = jnp.pad(x, ((0, Bp - B), (0, 0)))
    grid = (Bp // tb,)

    out_sds = jax.ShapeDtypeStruct((Bp, O), out_dtype)

    # --- VMEM budget: resident fused weight + double-buffered x/out tiles. ---
    x_itm = jnp.dtype(x.dtype).itemsize
    w_itm = jnp.dtype(w_cat.dtype).itemsize
    b_itm = jnp.dtype(b_cat.dtype).itemsize
    o_itm = jnp.dtype(out_dtype).itemsize
    vmem_need = (H * 3 * O * w_itm                     # resident fused weight
                 + 2 * 3 * O * b_itm                   # bias (double-buffered)
                 + 2 * tb * H * x_itm                  # double-buffered x tiles
                 + 2 * 3 * tb * O * o_itm)             # double-buffered outputs
    vmem_limit = min(100 * 1024 * 1024,
                     max(32 * 1024 * 1024, int(vmem_need * 5 // 4)))

    cost = pl.CostEstimate(
        flops=2 * Bp * H * 3 * O,
        transcendentals=3 * Bp * O,
        bytes_accessed=(Bp * H * x_itm + H * 3 * O * w_itm
                        + 3 * O * b_itm + 3 * Bp * O * o_itm),
    )

    miu, pi, theta = pl.pallas_call(
        _output_layer_kernel,
        out_shape=(out_sds, out_sds, out_sds),
        grid=grid,
        in_specs=[
            pl.BlockSpec((tb, H), lambda i: (i, 0)),          # x tile (pipelined)
            pl.BlockSpec((H, 3 * O), lambda i: (0, 0)),       # fused weight (resident)
            pl.BlockSpec((1, 3 * O), lambda i: (0, 0)),       # fused bias (resident)
        ],
        out_specs=(
            pl.BlockSpec((tb, O), lambda i: (i, 0)),
            pl.BlockSpec((tb, O), lambda i: (i, 0)),
            pl.BlockSpec((tb, O), lambda i: (i, 0)),
        ),
        compiler_params=pltpu.CompilerParams(
            dimension_semantics=("parallel",),                # megacore on v7x
            vmem_limit_bytes=vmem_limit,
        ),
        cost_estimate=cost,
    )(x, w_cat, b_cat)

    if Bp != B:
        miu, pi, theta = miu[:B], pi[:B], theta[:B]
    return miu, pi, theta


def _init_linear(key, fan_in, fan_out):
    """Deterministic Linear init (PyTorch-style uniform bounds). Returns (W^T, b)."""
    kw, kb = jax.random.split(key)
    bound = 1.0 / jnp.sqrt(fan_in)
    # PyTorch stores weight as (out, in); we store the transpose (in, out).
    w_t = jax.random.uniform(kw, (fan_in, fan_out), jnp.float32, -bound, bound)
    b = jax.random.uniform(kb, (1, fan_out), jnp.float32, -bound, bound)
    return w_t, b


if __name__ == "__main__":
    # Small shapes consistent with OutputLayer(features=[last_hidden, output_size]).
    batch = 390          # not a multiple of the batch tile -> exercises padding path
    last_hidden = 128
    output_size = 256

    key = jax.random.PRNGKey(0)
    kx, km, kp, kt = jax.random.split(key, 4)

    x = jax.random.normal(kx, (batch, last_hidden), jnp.float32)
    wm, bm = _init_linear(km, last_hidden, output_size)
    wp, bp = _init_linear(kp, last_hidden, output_size)
    wt, bt = _init_linear(kt, last_hidden, output_size)

    # block_b=128 -> multi-step pipelined grid even at this small batch.
    miu, pi, theta = output_layer(x, wm, bm, wp, bp, wt, bt, block_b=128)
    jax.block_until_ready((miu, pi, theta))

    # Pure-JAX reference check (f32 weights -> tight tolerance).
    ref_miu = jnp.exp(x @ wm + bm)
    ref_pi = jax.nn.sigmoid(x @ wp + bp)
    ref_theta = jnp.exp(x @ wt + bt)
    assert miu.shape == (batch, output_size)
    assert pi.shape == (batch, output_size)
    assert theta.shape == (batch, output_size)
    assert jnp.allclose(miu, ref_miu, rtol=1e-4, atol=1e-5)
    assert jnp.allclose(pi, ref_pi, rtol=1e-4, atol=1e-5)
    assert jnp.allclose(theta, ref_theta, rtol=1e-4, atol=1e-5)

    print("KERNEL_OK")
</pallas_src>

<mosaic_0001>
module attributes {stable_mosaic.version = 11 : i64} {
  func.func @_output_layer_kernel(%arg0: i32, %arg1: memref<128x128xf32, #tpu.memory_space<vmem>>, %arg2: memref<128x768xf32, #tpu.memory_space<vmem>>, %arg3: memref<1x768xf32, #tpu.memory_space<vmem>>, %arg4: memref<128x256xf32, #tpu.memory_space<vmem>>, %arg5: memref<128x256xf32, #tpu.memory_space<vmem>>, %arg6: memref<128x256xf32, #tpu.memory_space<vmem>>) attributes {dimension_semantics = [#tpu.dimension_semantics<parallel>], iteration_bounds = array<i64: 4>, scalar_prefetch = 0 : i64, scratch_operands = 0 : i64, tpu.core_type = #tpu.core_type<tc>, window_params = [{transform_indices = @transform_0, window_bounds = array<i64: 128, 128>}, {pipeline_mode = #tpu.pipeline_mode<synchronous>, transform_indices = @transform_1, window_bounds = array<i64: 128, 768>}, {pipeline_mode = #tpu.pipeline_mode<synchronous>, transform_indices = @transform_2, window_bounds = array<i64: 1, 768>}, {transform_indices = @transform_3, window_bounds = array<i64: 128, 256>}, {transform_indices = @transform_4, window_bounds = array<i64: 128, 256>}, {transform_indices = @transform_5, window_bounds = array<i64: 128, 256>}]} {
    %c0 = arith.constant 0 : index
    %c0_0 = arith.constant 0 : index
    %0 = vector.load %arg1[%c0, %c0_0] : memref<128x128xf32, #tpu.memory_space<vmem>>, vector<128x128xf32>
    %c0_1 = arith.constant 0 : index
    %c0_2 = arith.constant 0 : index
    %1 = vector.load %arg2[%c0_1, %c0_2] : memref<128x768xf32, #tpu.memory_space<vmem>>, vector<128x768xf32>
    %cst = arith.constant dense<0.000000e+00> : vector<128x768xf32>
    %2 = tpu.matmul %0, %1, %cst {dimension_numbers = #tpu.dot_dimension_numbers<[1], [0], [0], [1], [0, 0, 1, 1], [], []>} : vector<128x128xf32>, vector<128x768xf32>, vector<128x768xf32> -> vector<128x768xf32>
    %c0_3 = arith.constant 0 : index
    %c0_4 = arith.constant 0 : index
    %3 = vector.load %arg3[%c0_3, %c0_4] : memref<1x768xf32, #tpu.memory_space<vmem>>, vector<1x768xf32>
    %4 = vector.broadcast %3 : vector<1x768xf32> to vector<128x768xf32>
    %5 = arith.addf %2, %4 : vector<128x768xf32>
    %6 = vector.extract_strided_slice %5 {offsets = [0, 0], sizes = [128, 256], strides = [1, 1]} : vector<128x768xf32> to vector<128x256xf32>
    %7 = vector.extract_strided_slice %5 {offsets = [0, 256], sizes = [128, 256], strides = [1, 1]} : vector<128x768xf32> to vector<128x256xf32>
    %8 = vector.extract_strided_slice %5 {offsets = [0, 512], sizes = [128, 256], strides = [1, 1]} : vector<128x768xf32> to vector<128x256xf32>
    %9 = math.exp %6 : vector<128x256xf32>
    %c0_5 = arith.constant 0 : index
    %c0_6 = arith.constant 0 : index
    %10 = vector.load %arg4[%c0_5, %c0_6] : memref<128x256xf32, #tpu.memory_space<vmem>>, vector<128x256xf32>
    tpu.vector_store %arg4[%c0_5, %c0_6], %9 {strides = array<i32>} : memref<128x256xf32, #tpu.memory_space<vmem>>, vector<128x256xf32>,
    %cst_7 = arith.constant 5.000000e-01 : f32
    %11 = vector.broadcast %cst_7 : f32 to vector<128x256xf32>
    %12 = arith.mulf %11, %7 : vector<128x256xf32>
    %13 = math.tanh %12 : vector<128x256xf32>
    %cst_8 = arith.constant 5.000000e-01 : f32
    %14 = vector.broadcast %cst_8 : f32 to vector<128x256xf32>
    %15 = arith.mulf %14, %13 : vector<128x256xf32>
    %cst_9 = arith.constant 5.000000e-01 : f32
    %16 = vector.broadcast %cst_9 : f32 to vector<128x256xf32>
    %17 = arith.addf %15, %16 : vector<128x256xf32>
    %c0_10 = arith.constant 0 : index
    %c0_11 = arith.constant 0 : index
    %18 = vector.load %arg5[%c0_10, %c0_11] : memref<128x256xf32, #tpu.memory_space<vmem>>, vector<128x256xf32>
    tpu.vector_store %arg5[%c0_10, %c0_11], %17 {strides = array<i32>} : memref<128x256xf32, #tpu.memory_space<vmem>>, vector<128x256xf32>,
    %19 = math.exp %8 : vector<128x256xf32>
    %c0_12 = arith.constant 0 : index
    %c0_13 = arith.constant 0 : index
    %20 = vector.load %arg6[%c0_12, %c0_13] : memref<128x256xf32, #tpu.memory_space<vmem>>, vector<128x256xf32>
    tpu.vector_store %arg6[%c0_12, %c0_13], %19 {strides = array<i32>} : memref<128x256xf32, #tpu.memory_space<vmem>>, vector<128x256xf32>,
    return
  }
  func.func @transform_0(%arg0: i32) -> (i32, i32) {
    %c0_i32 = arith.constant 0 : i32
    %c0_i32_0 = arith.constant 0 : i32
    return %arg0, %c0_i32 : i32, i32
  }
  func.func @transform_1(%arg0: i32) -> (i32, i32) {
    %c0_i32 = arith.constant 0 : i32
    %c0_i32_0 = arith.constant 0 : i32
    %c0_i32_1 = arith.constant 0 : i32
    return %c0_i32, %c0_i32_0 : i32, i32
  }
  func.func @transform_2(%arg0: i32) -> (i32, i32) {
    %c0_i32 = arith.constant 0 : i32
    %c0_i32_0 = arith.constant 0 : i32
    %c0_i32_1 = arith.constant 0 : i32
    return %c0_i32, %c0_i32_0 : i32, i32
  }
  func.func @transform_3(%arg0: i32) -> (i32, i32) {
    %c0_i32 = arith.constant 0 : i32
    %c0_i32_0 = arith.constant 0 : i32
    return %arg0, %c0_i32 : i32, i32
  }
  func.func @transform_4(%arg0: i32) -> (i32, i32) {
    %c0_i32 = arith.constant 0 : i32
    %c0_i32_0 = arith.constant 0 : i32
    return %arg0, %c0_i32 : i32, i32
  }
  func.func @transform_5(%arg0: i32) -> (i32, i32) {
    %c0_i32 = arith.constant 0 : i32
    %c0_i32_0 = arith.constant 0 : i32
    return %arg0, %c0_i32 : i32, i32
  }
}

</mosaic_0001>

<bundles_post_ra>
// kernel: tpu_custom_call.1
= control target key start
LH: loop header
LB: loop body
LE: loop exit
PB: predicated region body
PF: predicated region fallthrough
CT: control target
= control target key end

     0   :  { %11 = vsyncpa [#allocation3], 0  ;;  %s2751_s0 = inlined_call_operand.hbm [shape: f32[512,128], index: 0, kind: input, shape index: {}]   ;;  %s2752_s1 = inlined_call_operand.hbm [shape: f32[128,768], index: 1, kind: input, shape index: {}]   ;;  %s2753_s2 = inlined_call_operand.vmem [shape: f32[1,768], index: 2, kind: input, shape index: {}]   ;;  %s2754_s3 = inlined_call_operand.hbm [shape: f32[512,256], index: 3, kind: output, shape index: {0}]   ;;  %s2755_s4 = inlined_call_operand.hbm [shape: f32[512,256], index: 4, kind: output, shape index: {1}]   ;;  %s2756_s5 = inlined_call_operand.hbm [shape: f32[512,256], index: 5, kind: output, shape index: {2}]  }
   0x1   :  { %13 = vsyncpa [#allocation3 + $0x1], 0 }
   0x2   :  { %14 = vsyncpa [#allocation6], 0 }
   0x3   :  { %15 = vsyncpa [#allocation4], 0 }
   0x4   :  { %17 = vsyncpa [#allocation4 + $0x1], 0 }
   0x5   :  { %18 = vsyncpa [#allocation9], 0 }
   0x6   :  { %20 = vsyncpa [#allocation9 + $0x1], 0  ;;  %s2106_s18 = smov 0   ;;  %s2108_s19 = smov 0  }
   0x7   :  { %s2110_s20 = smov 0   ;;  %s2112_s21 = smov 0  }
   0x8 LB: > { %s2127_s22 = sadd.s32 4294967295, %s2062_s21   ;;  %s1462_s23 = sadd.s32 4294967294, %s2062_s21   ;;  %s2062_s21 = sphi %s2112_s21, %s2775_s21   ;;  %s2058_s20 = sphi %s2110_s20, %s2774_s20   ;;  %s2054_s19 = sphi %s2108_s19, %s2773_s19   ;;  %s2050_s18 = sphi %s2106_s18, %s2772_s18  }
   0x9   : > { %p46_p0 = scmp.ne.s32.totalorder %s2054_s19, %s2050_s18  ;;  %p2757_p1 = scmp.eq.s32.totalorder %s2127_s22, 0 }
   0xa   : > { %p118_p3 = scmp.eq.s32.totalorder %s1462_s23, 3  ;;  %p1463_p5 = scmp.ge.s32.totalorder %s2062_s21, 1 }
   0xb   : > { %p2138_p4 = por %p2757_p1, %p46_p0  ;;  %p177_p7 = scmp.lt.s32.totalorder %s2062_s21, 5 }
   0xc   : > { %p2143_p6 = por %p118_p3, %p46_p0  ;;  %s2064_s27 = smov [#allocation5]  }
   0xd   : > { %s2760_s24 = scalar_select %p2138_p4, 1, 0 }
   0xe   : > { %s2761_s25 = scalar_select %p2143_p6, 1, 0 }
   0xf   : > { %p2148_p8 = pnand %p1463_p5, %p177_p7  ;;  %s189_s28 = sshll.u32 %s2064_s27, 4  ;;  %s190_s28 = int_to_ptr.vmem [resolvable:$true] %s189_s28 }
  0x10   : > { %s2161_s30 = sadd.s32 1, %s2062_s21   ;;  %s33_s6 = sadd.s32 1, %s2058_s20 }
  0x11   : > { %s2762_s26 = scalar_select %p2148_p8, 1, 0 }
  0x12   : > { %p1620_p9 = pneg %p2148_p8  ;;  %s30_s7 = ssub.s32 %s2062_s21, %s2161_s30 }
  0x13   : > { %s1874_s10 = scalar_lea.hbm %s2752_s1, 12288 }
  0x14   : > { %p2156_p10 = pnand %p1620_p9, %p2757_p1  ;;  %p1875_p11 = scmp.ne.s32.totalorder %s2752_s1, %s1874_s10 }
  0x15   : > { %p1881_p3 = scmp.lt.u32.totalorder %s1874_s10, %s2752_s1 }
  0x16   : > { %p1876_p12 = pneg %p2156_p10 }
  0x18   : > { %p1877_p13 = pnand %p1876_p12, %p1875_p11 }
  0x1a   : > { %p1878_p0 = pneg %p1877_p13 }
  0x1c   : > { %p1883_p5 = pnand %p1881_p3, %p1878_p0 }
  0x1e   : > { %1886 = shalt.err (!%p1883_p5)
}
  0x1f   : > { %s1887_s15 = scalar_lea.vmem %s190_s28, 12288  ;;  %p1895_p2 = scmp.lt.s32.totalorder %s190_s28, %s190_s28 }
  0x20   : > { %p1888_p7 = scmp.ne.s32.totalorder %s190_s28, %s1887_s15  ;;  %p1896_p6 = scmp.lt.s32.totalorder %s1887_s15, %s1887_s15 }
  0x22   : > { %p1890_p9 = pnand %p1888_p7, %p1876_p12  ;;  %p1897_p4 = por %p1896_p6, %p1895_p2 }
  0x24   : > { %p1891_p1 = pneg %p1890_p9 }
  0x26   : > { %p1898_p8 = pnand %p1897_p4, %p1891_p1 }
  0x28   : > { %1901 = shalt.err (!%p1898_p8)
}
  0x29   : > { %s2065_s16 = smov 768   ;;  %s2066_s17 = smov 48  }
  0x2a   : > { %1623 = dma.hbm_to_vmem [thread:$0]  (!%p2156_p10), %s2752_s1, 12288, %s190_s28, [#allocation6], %s2065_s16, %s2065_s16, %s2066_s17  }
  0x2b   : > { %p31_p11 = scmp.eq.s32.totalorder %s30_s7, 0  ;;  %p40_p2 = scmp.ne.s32.totalorder %s2058_s20, %s2054_s19 }
  0x2c   : > { %p41_p1 = scmp.eq.s32.totalorder %s2062_s21, 0  ;;  %p1639_p4 = scmp.lt.s32.totalorder %s2062_s21, 4 }
  0x2d   : > { %s2187_s9 = scalar_select %p31_p11, %s2058_s20, %s33_s6  }
  0x2e   : > { %p42_p6 = por %p41_p1, %p40_p2  ;;  %p2764_p8 = scmp.eq.s32.totalorder %s2127_s22, 3 }
  0x2f   : > { %s206_s11 = sand.u32 1, %s2058_s20   ;;  %s1489_s12 = sshll.u32 %s2062_s21, 11 }
  0x30   : > { %p2191_p12 = por %p2764_p8, %p40_p2  ;;  %s1466_s13 = sshll.u32 %s206_s11, 7 }
  0x31   : > { %s2200_s15 = scalar_lea.hbm %s2751_s0, %s1489_s12  ;;  %s210_s28 = scalar_lea.vmem [#allocation2], %s1466_s13 }
  0x32   : > { %s217_s6 = sshll.u32 %s210_s28, 4  ;;  %p2202_p10 = pnand %p1639_p4, %p42_p6  ;;  %s2206_s6 = int_to_ptr.vmem [resolvable:$true] %s217_s6 }
  0x33   : > { %s2208_s16 = scalar_lea.sflag [#allocation3], %s206_s11  ;;  %s1902_s17 = scalar_lea.hbm %s2200_s15, 2048 }
  0x34   : > { %p1903_p13 = scmp.ne.s32.totalorder %s2200_s15, %s1902_s17  ;;  %p1904_p0 = pneg %p2202_p10 }
  0x35   : > { %s1907_s12 = scalar_lea.hbm %s2751_s0, 8192  ;;  %p1908_p7 = scmp.lt.u32.totalorder %s2200_s15, %s2751_s0 }
  0x36   : > { %p1905_p3 = pnand %p1904_p0, %p1903_p13  ;;  %p1909_p9 = scmp.lt.u32.totalorder %s1907_s12, %s1902_s17 }
  0x37   : > { %p1911_p2 = scmp.lt.u32.totalorder %s1902_s17, %s2200_s15 }
  0x38   : > { %p1906_p5 = pneg %p1905_p3  ;;  %p1910_p11 = por %p1909_p9, %p1908_p7 }
  0x3a   : > { %p1912_p1 = por %p1911_p2, %p1910_p11 }
  0x3c   : > { %p1913_p4 = pnand %p1912_p1, %p1906_p5 }
  0x3e   : > { %1916 = shalt.err (!%p1913_p4)
}
  0x3f   : > { %s1917_s11 = scalar_lea.vmem %s2206_s6, 2048  ;;  %s2067_s14 = smov [#allocation2]  }
  0x40   : > { %p1918_p6 = scmp.ne.s32.totalorder %s2206_s6, %s1917_s11  ;;  %s1922_s28 = sshll.u32 %s2067_s14, 4  ;;  %s1923_s28 = int_to_ptr.vmem [resolvable:$false] %s1922_s28 }
  0x41   : > { %s1924_s27 = scalar_lea.vmem %s1923_s28, 4096  ;;  %p1925_p3 = scmp.lt.s32.totalorder %s2206_s6, %s1923_s28 }
  0x42   : > { %p1920_p8 = pnand %p1918_p6, %p1904_p0  ;;  %p1926_p7 = scmp.lt.s32.totalorder %s1924_s27, %s1917_s11 }
  0x44   : > { %p1921_p13 = pneg %p1920_p8  ;;  %p1927_p9 = por %p1926_p7, %p1925_p3 }
  0x46   : > { %p1928_p11 = pnand %p1927_p9, %p1921_p13 }
  0x48   : > { %1931 = shalt.err (!%p1928_p11)
}
  0x49   : > { %s2068_s17 = smov 128   ;;  %s2069_s8 = smov 8  }
  0x4a   : > { %1627 = dma.hbm_to_vmem [thread:$0]  (!%p2202_p10), %s2200_s15, 2048, %s2206_s6, %s2208_s16, %s2068_s17, %s2068_s17, %s2069_s8  }
  0x4b   : > { %p2767_p0 = scmp.ne.s32.totalorder %s2762_s26, 0 }
  0x4c   : > { %s2239_s12 = sand.u32 (!%p2767_p0), 1, %s2054_s19   ;;  %p2768_p5 = scmp.ne.s32.totalorder (!%p2767_p0), %s2760_s24, 0 }
  0x4d   : > { %229 = sbr.rel (%p2767_p0) target bundleno = 502 (0x1f6), region = 32  ;;  %s1470_s13 = sshll.u32 (!%p2767_p0), %s2239_s12, 7 }
  0x4e   : > { %s232_s29 = scalar_lea.sflag (!%p2767_p0), [#allocation3], %s2239_s12  ;;  %s2243_s11 = scalar_lea.vmem (!%p2767_p0), [#allocation2], %s1470_s13 }
  0x54   : > { %2033 = dma.done.wait (%p2768_p5), %s232_s29, 2048  }
  0x55   : > { %2035 = vsyncadd (%p2768_p5), %s232_s29, 4294965248  ;;  %p2769_p10 = scmp.eq.s32.totalorder %s2127_s22, 0 }
  0x57   : > { %2037 = dma.done.wait (%p2769_p10), [#allocation6], 12288   ;;  %p2770_p2 = pmov %p2769_p10 }
  0x58   : > { %v2070_v0 = vmov 0.0   ;;  %v297_v1 = vld [vmem:[#allocation5 + $0x8] sm:$0xff]  ;;  %v303_v2 = vld [vmem:[#allocation5 + $0x38] sm:$0xff]  ;;  %v296_v3 = vld [vmem:[#allocation5] sm:$0xff]  ;;  %s2413_s15 = sshll.u32 %s2239_s12, 8  ;;  %s2495_s7 = sshll.u32 %s2127_s22, 12 }
  0x59   : > { %2039 = vsyncadd (%p2770_p2), [#allocation6], 4294955008  ;;  %536 = vmatprep.mubr.f32.mxu1 %v2070_v0  ;;  %488 = vmatprep.mubr.f32.mxu0 %v2070_v0  ;;  %v1496_v4 = vpack.c.bf16 %v303_v2, %v297_v1  ;;  %v302_v5 = vld [vmem:[#allocation5 + $0x30] sm:$0xff]  ;;  %v309_v6 = vld [vmem:[#allocation5 + $0x68] sm:$0xff]  ;;  %s2422_s6 = scalar_lea.vmem [#allocation7], %s2413_s15  ;;  %s2507_s27 = scalar_lea.hbm %s2754_s3, %s2495_s7 }
  0x5a   : > { %v315_v7 = vld [vmem:[#allocation5 + $0x98] sm:$0xff]  ;;  %v1498_v8 = vpack.c.bf16 %v302_v5, %v296_v3  ;;  %v308_v10 = vld [vmem:[#allocation5 + $0x60] sm:$0xff]  ;;  %v314_v11 = vld [vmem:[#allocation5 + $0x90] sm:$0xff]  ;;  %s1284_s16 = sshll.u32 %s2422_s6, 4  ;;  %s1260_s17 = scalar_lea.sflag [#allocation4], %s2239_s12  ;;  %s2509_s16 = int_to_ptr.vmem [resolvable:$true] %s1284_s16 }
  0x5b   : > { %v1500_v9 = vpack.c.bf16 %v315_v7, %v309_v6  ;;  %v321_v12 = vld [vmem:[#allocation5 + $0xc8] sm:$0xff]  ;;  %1592 = vmatprep.subr.bf16.mxu1 %v1496_v4  ;;  %1497 = vmatprep.subr.bf16.mxu0 %v1496_v4  ;;  %v327_v13 = vld [vmem:[#allocation5 + $0xf8] sm:$0xff]  ;;  %v1502_v14 = vpack.c.bf16 %v314_v11, %v308_v10  ;;  %v320_v16 = vld [vmem:[#allocation5 + $0xc0] sm:$0xff]  ;;  %s1932_s8 = scalar_lea.vmem %s2509_s16, 4096  ;;  %s2071_s13 = smov [#allocation7]  }
  0x5c   : > { %1600 = vmatpush1.bf16.msra.mxu1 %v1498_v8  ;;  %1499 = vmatpush1.bf16.msra.mxu0 %v1498_v8  ;;  %v1504_v15 = vpack.c.bf16 %v327_v13, %v321_v12  ;;  %v326_v17 = vld [vmem:[#allocation5 + $0xf0] sm:$0xff]  ;;  %v333_v18 = vld [vmem:[#allocation5 + $0x128] sm:$0xff]  ;;  %v339_v19 = vld [vmem:[#allocation5 + $0x158] sm:$0xff]  ;;  %p1933_p1 = scmp.ne.s32.totalorder %s2509_s16, %s1932_s8  ;;  %s1936_s29 = sshll.u32 %s2071_s13, 4  ;;  %s1937_s29 = int_to_ptr.vmem [resolvable:$false] %s1936_s29 }
  0x5d   : > { %1593 = vmatprep.subr.bf16.mxu1 %v1500_v9  ;;  %1501 = vmatprep.subr.bf16.mxu0 %v1500_v9  ;;  %v1506_v20 = vpack.c.bf16 %v326_v17, %v320_v16  ;;  %v1508_v21 = vpack.c.bf16 %v339_v19, %v333_v18  ;;  %v332_v22 = vld [vmem:[#allocation5 + $0x120] sm:$0xff]  ;;  %v338_v23 = vld [vmem:[#allocation5 + $0x150] sm:$0xff]  ;;  %v345_v24 = vld [vmem:[#allocation5 + $0x188] sm:$0xff]  ;;  %p1939_p8 = scmp.lt.s32.totalorder %s2509_s16, %s1937_s29 }
  0x5e   : > { %v351_v25 = vld [vmem:[#allocation5 + $0x1b8] sm:$0xff]  ;;  %v1510_v26 = vpack.c.bf16 %v338_v23, %v332_v22  ;;  %v344_v28 = vld [vmem:[#allocation5 + $0x180] sm:$0xff]  ;;  %v350_v29 = vld [vmem:[#allocation5 + $0x1b0] sm:$0xff]  ;;  %p1934_p4 = pnand %p1933_p1, %p2191_p12 }
  0x5f   : > { %v1512_v27 = vpack.c.bf16 %v351_v25, %v345_v24  ;;  %v357_v30 = vld [vmem:[#allocation5 + $0x1e8] sm:$0xff]  ;;  %v363_v31 = vld [vmem:[#allocation5 + $0x218] sm:$0xff]  ;;  %v1514_v32 = vpack.c.bf16 %v350_v29, %v344_v28  ;;  %v356_v34 = vld [vmem:[#allocation5 + $0x1e0] sm:$0xff] }
  0x60   : > { %1601 = vmatpush1.bf16.msra.mxu1 %v1502_v14  ;;  %1503 = vmatpush1.bf16.msra.mxu0 %v1502_v14  ;;  %v1516_v33 = vpack.c.bf16 %v363_v31, %v357_v30  ;;  %v362_v35 = vld [vmem:[#allocation5 + $0x210] sm:$0xff]  ;;  %v369_v36 = vld [vmem:[#allocation5 + $0x248] sm:$0xff]  ;;  %v375_v37 = vld [vmem:[#allocation5 + $0x278] sm:$0xff]  ;;  %p1935_p6 = pneg %p1934_p4 }
  0x61   : > { %1594 = vmatprep.subr.bf16.mxu1 %v1504_v15  ;;  %1505 = vmatprep.subr.bf16.mxu0 %v1504_v15  ;;  %v1518_v38 = vpack.c.bf16 %v362_v35, %v356_v34  ;;  %v1520_v39 = vpack.c.bf16 %v375_v37, %v369_v36  ;;  %v368_v40 = vld [vmem:[#allocation5 + $0x240] sm:$0xff]  ;;  %v374_v41 = vld [vmem:[#allocation5 + $0x270] sm:$0xff]  ;;  %v381_v42 = vld [vmem:[#allocation5 + $0x2a8] sm:$0xff] }
  0x62   : > { %v387_v43 = vld [vmem:[#allocation5 + $0x2d8] sm:$0xff]  ;;  %v1522_v44 = vpack.c.bf16 %v374_v41, %v368_v40  ;;  %v380_v46 = vld [vmem:[#allocation5 + $0x2a0] sm:$0xff]  ;;  %v386_v47 = vld [vmem:[#allocation5 + $0x2d0] sm:$0xff] }
  0x63   : > { %v1524_v45 = vpack.c.bf16 %v387_v43, %v381_v42  ;;  %v299_v48 = vld [vmem:[#allocation5 + $0x18] sm:$0xff]  ;;  %v305_v49 = vld [vmem:[#allocation5 + $0x48] sm:$0xff]  ;;  %v1526_v52 = vpack.c.bf16 %v386_v47, %v380_v46  ;;  %v298_v54 = vld [vmem:[#allocation5 + $0x10] sm:$0xff] }
  0x64   : > { %1602 = vmatpush1.bf16.msra.mxu1 %v1506_v20  ;;  %1507 = vmatpush1.bf16.msra.mxu0 %v1506_v20  ;;  %v301_v50 = vld [vmem:[#allocation5 + $0x28] sm:$0xff]  ;;  %v307_v51 = vld [vmem:[#allocation5 + $0x58] sm:$0xff]  ;;  %v1528_v53 = vpack.c.bf16 %v305_v49, %v299_v48  ;;  %v304_v55 = vld [vmem:[#allocation5 + $0x40] sm:$0xff] }
  0x65   : > { %1595 = vmatprep.subr.bf16.mxu1 %v1508_v21  ;;  %1509 = vmatprep.subr.bf16.mxu0 %v1508_v21  ;;  %v311_v56 = vld [vmem:[#allocation5 + $0x78] sm:$0xff]  ;;  %v1560_v57 = vpack.c.bf16 %v307_v51, %v301_v50  ;;  %v317_v58 = vld [vmem:[#allocation5 + $0xa8] sm:$0xff]  ;;  %v300_v59 = vld [vmem:[#allocation5 + $0x20] sm:$0xff]  ;;  %v1530_v1 = vpack.c.bf16 %v304_v55, %v298_v54 }
  0x66   : > { %v306_v60 = vld [vmem:[#allocation5 + $0x50] sm:$0xff]  ;;  %v313_v61 = vld [vmem:[#allocation5 + $0x88] sm:$0xff]  ;;  %v319_v62 = vld [vmem:[#allocation5 + $0xb8] sm:$0xff]  ;;  %v1532_v3 = vpack.c.bf16 %v317_v58, %v311_v56 }
  0x67   : > { %v2256_v63 = vld [vmem:[%s2243_s11 + $0x40] sm:$0xff]  ;;  %v310_v4 = vld [vmem:[#allocation5 + $0x70] sm:$0xff]  ;;  %v1562_v6 = vpack.c.bf16 %v306_v60, %v300_v59  ;;  %v323_v7 = vld [vmem:[#allocation5 + $0xd8] sm:$0xff]  ;;  %v1564_v9 = vpack.c.bf16 %v319_v62, %v313_v61 }
  0x68   : > { %1603 = vmatpush1.bf16.msra.mxu1 %v1510_v26  ;;  %1511 = vmatpush1.bf16.msra.mxu0 %v1510_v26  ;;  %v2259_v2 = vld [vmem:[%s2243_s11] sm:$0xff]  ;;  %v329_v8 = vld [vmem:[#allocation5 + $0x108] sm:$0xff]  ;;  %v318_v11 = vld [vmem:[#allocation5 + $0xb0] sm:$0xff] }
  0x69   : > { %1596 = vmatprep.subr.bf16.mxu1 %v1512_v27  ;;  %1513 = vmatprep.subr.bf16.mxu0 %v1512_v27  ;;  %v316_v5 = vld [vmem:[#allocation5 + $0xa0] sm:$0xff]  ;;  %v325_v12 = vld [vmem:[#allocation5 + $0xe8] sm:$0xff]  ;;  %v331_v13 = vld [vmem:[#allocation5 + $0x118] sm:$0xff]  ;;  %v1536_v17 = vpack.c.bf16 %v329_v8, %v323_v7 }
  0x6a   : > { %v312_v10 = vld [vmem:[#allocation5 + $0x80] sm:$0xff]  ;;  %v2265_v14 = vld [vmem:[%s2243_s11 + $0x48] sm:$0xff]  ;;  %v1534_v15 = vpack.c.bf16 %v316_v5, %v310_v4  ;;  %v322_v18 = vld [vmem:[#allocation5 + $0xd0] sm:$0xff]  ;;  %v1568_v23 = vpack.c.bf16 %v331_v13, %v325_v12 }
  0x6b   : > { %v2268_v16 = vld [vmem:[%s2243_s11 + $0x8] sm:$0xff]  ;;  %v328_v19 = vld [vmem:[#allocation5 + $0x100] sm:$0xff]  ;;  %v1566_v20 = vpack.c.bf16 %v318_v11, %v312_v10  ;;  %v335_v21 = vld [vmem:[#allocation5 + $0x138] sm:$0xff] }
  0x6c   : > { %1604 = vmatpush1.bf16.msra.mxu1 %v1514_v32  ;;  %1515 = vmatpush1.bf16.msra.mxu0 %v1514_v32  ;;  %v341_v22 = vld [vmem:[#allocation5 + $0x168] sm:$0xff]  ;;  %v324_v24 = vld [vmem:[#allocation5 + $0xe0] sm:$0xff]  ;;  %v330_v25 = vld [vmem:[#allocation5 + $0x110] sm:$0xff]  ;;  %v1538_v29 = vpack.c.bf16 %v328_v19, %v322_v18 }
  0x6d   : > { %1597 = vmatprep.subr.bf16.mxu1 %v1516_v33  ;;  %1517 = vmatprep.subr.bf16.mxu0 %v1516_v33  ;;  %v337_v26 = vld [vmem:[#allocation5 + $0x148] sm:$0xff]  ;;  %v343_v27 = vld [vmem:[#allocation5 + $0x178] sm:$0xff]  ;;  %v2275_v28 = vld [vmem:[%s2243_s11 + $0x50] sm:$0xff]  ;;  %v1540_v31 = vpack.c.bf16 %v341_v22, %v335_v21  ;;  %v1570_v34 = vpack.c.bf16 %v330_v25, %v324_v24 }
  0x6e   : > { %v2278_v30 = vld [vmem:[%s2243_s11 + $0x10] sm:$0xff]  ;;  %v340_v33 = vld [vmem:[#allocation5 + $0x160] sm:$0xff]  ;;  %v347_v35 = vld [vmem:[#allocation5 + $0x198] sm:$0xff]  ;;  %v1572_v37 = vpack.c.bf16 %v343_v27, %v337_v26 }
  0x6f   : > { %v334_v32 = vld [vmem:[#allocation5 + $0x130] sm:$0xff]  ;;  %v353_v36 = vld [vmem:[#allocation5 + $0x1c8] sm:$0xff]  ;;  %v355_v41 = vld [vmem:[#allocation5 + $0x1d8] sm:$0xff] }
  0x70   : > { %1605 = vmatpush1.bf16.msra.mxu1 %v1518_v38  ;;  %1519 = vmatpush1.bf16.msra.mxu0 %v1518_v38  ;;  %v336_v38 = vld [vmem:[#allocation5 + $0x140] sm:$0xff]  ;;  %v349_v40 = vld [vmem:[#allocation5 + $0x1a8] sm:$0xff]  ;;  %v2285_v42 = vld [vmem:[%s2243_s11 + $0x58] sm:$0xff]  ;;  %v1542_v43 = vpack.c.bf16 %v340_v33, %v334_v32 }
  0x71   : > { %1598 = vmatprep.subr.bf16.mxu1 %v1520_v39  ;;  %1521 = vmatprep.subr.bf16.mxu0 %v1520_v39  ;;  %v342_v39 = vld [vmem:[#allocation5 + $0x170] sm:$0xff]  ;;  %v352_v47 = vld [vmem:[#allocation5 + $0x1c0] sm:$0xff]  ;;  %v359_v49 = vld [vmem:[#allocation5 + $0x1f8] sm:$0xff]  ;;  %v1576_v51 = vpack.c.bf16 %v355_v41, %v349_v40 }
  0x72   : > { %v346_v46 = vld [vmem:[#allocation5 + $0x190] sm:$0xff]  ;;  %v1574_v48 = vpack.c.bf16 %v342_v39, %v336_v38  ;;  %v365_v50 = vld [vmem:[#allocation5 + $0x228] sm:$0xff]  ;;  %v367_v55 = vld [vmem:[#allocation5 + $0x238] sm:$0xff] }
  0x73   : > { %v361_v54 = vld [vmem:[#allocation5 + $0x208] sm:$0xff]  ;;  %v2295_v56 = vld [vmem:[%s2243_s11 + $0x60] sm:$0xff]  ;;  %v1548_v59 = vpack.c.bf16 %v365_v50, %v359_v49  ;;  %v358_v60 = vld [vmem:[#allocation5 + $0x1f0] sm:$0xff] }
  0x74   : > { %1606 = vmatpush1.bf16.msra.mxu1 %v1522_v44  ;;  %1523 = vmatpush1.bf16.msra.mxu0 %v1522_v44  ;;  %v2288_v44 = vld [vmem:[%s2243_s11 + $0x18] sm:$0xff]  ;;  %v2298_v58 = vld [vmem:[%s2243_s11 + $0x20] sm:$0xff]  ;;  %v1580_v4 = vpack.c.bf16 %v367_v55, %v361_v54  ;;  %v373_v7 = vld [vmem:[#allocation5 + $0x268] sm:$0xff] }
  0x75   : > { %1599 = vmatprep.subr.bf16.mxu1 %v1524_v45  ;;  %1525 = vmatprep.subr.bf16.mxu0 %v1524_v45  ;;  %v1544_v45 = vpack.c.bf16 %v353_v36, %v347_v35  ;;  %v364_v61 = vld [vmem:[#allocation5 + $0x220] sm:$0xff]  ;;  %v379_v8 = vld [vmem:[#allocation5 + $0x298] sm:$0xff]  ;;  %v2308_v11 = vld [vmem:[%s2243_s11 + $0x28] sm:$0xff] }
  0x76   : > { %v360_v5 = vld [vmem:[#allocation5 + $0x200] sm:$0xff]  ;;  %v1550_v10 = vpack.c.bf16 %v364_v61, %v358_v60  ;;  %v370_v13 = vld [vmem:[#allocation5 + $0x250] sm:$0xff]  ;;  %v383_v18 = vld [vmem:[#allocation5 + $0x2b8] sm:$0xff] }
  0x77   : > { %v389_v19 = vld [vmem:[#allocation5 + $0x2e8] sm:$0xff]  ;;  %v372_v21 = vld [vmem:[#allocation5 + $0x260] sm:$0xff]  ;;  %v378_v22 = vld [vmem:[#allocation5 + $0x290] sm:$0xff] }
  0x78   : > { %1607 = vmatpush1.bf16.msra.mxu1 %v1526_v52  ;;  %1527 = vmatpush1.bf16.msra.mxu0 %v1526_v52  ;;  %v348_v52 = vld [vmem:[#allocation5 + $0x1a0] sm:$0xff]  ;;  %v391_v24 = vld [vmem:[#allocation5 + $0x2f8] sm:$0xff]  ;;  %v2315_v25 = vld [vmem:[%s2243_s11 + $0x70] sm:$0xff]  ;;  %v1586_v33 = vpack.c.bf16 %v378_v22, %v372_v21 }
  0x79   : > { %1529 = vmatprep.subr.bf16.mxu1 %v1528_v53  ;;  %1561 = vmatprep.subr.bf16.mxu0 %v1560_v57  ;;  %v354_v53 = vld [vmem:[#allocation5 + $0x1d0] sm:$0xff]  ;;  %v1546_v57 = vpack.c.bf16 %v352_v47, %v346_v46  ;;  %v388_v32 = vld [vmem:[#allocation5 + $0x2e0] sm:$0xff]  ;;  %v287_v39 = vld [vmem:[%s2243_s11 + $0x38] sm:$0xff] }
  0x7a   : > { %v1578_v62 = vpack.c.bf16 %v354_v53, %v348_v52  ;;  %v286_v27 = vld [vmem:[%s2243_s11 + $0x30] sm:$0xff]  ;;  %v384_v35 = vld [vmem:[#allocation5 + $0x2c0] sm:$0xff] }
  0x7b   : > { %537 = vmatmul.mubr.f32.vlgmr.msra.gmra.mrb[0].mxu1 %v2256_v63  ;;  %489 = vmatmul.mubr.f32.vlgmr.msra.gmra.mrb[0].mxu0 %v2259_v2  ;;  %v390_v36 = vld [vmem:[#allocation5 + $0x2f0] sm:$0xff] }
  0x7c   : > { %1531 = vmatpush1.bf16.msra.mxu1 %v1530_v1  ;;  %542 = vmatprep.mubr.f32.mxu1 %v2070_v0  ;;  %v371_v1 = vld [vmem:[#allocation5 + $0x258] sm:$0xff]  ;;  %v1590_v40 = vpack.c.bf16 %v390_v36, %v384_v35 }
  0x7d   : > { %1533 = vmatprep.subr.bf16.mxu1 %v1532_v3  ;;  %1563 = vmatpush1.bf16.msra.mxu0 %v1562_v6  ;;  %v377_v3 = vld [vmem:[#allocation5 + $0x288] sm:$0xff]  ;;  %v366_v6 = vld [vmem:[#allocation5 + $0x230] sm:$0xff] }
  0x7e   : > { %494 = vmatprep.mubr.f32.mxu0 %v2070_v0  ;;  %1565 = vmatprep.subr.bf16.mxu0 %v1564_v9  ;;  %v2305_v9 = vld [vmem:[%s2243_s11 + $0x68] sm:$0xff]  ;;  %v1552_v12 = vpack.c.bf16 %v377_v3, %v371_v1 }
  0x7f   : > { %543 = vmatmul.mubr.f32.gmra.mrb[2].mxu1 %v2265_v14  ;;  %495 = vmatmul.mubr.f32.gmra.mrb[2].mxu0 %v2268_v16 }
  0x80   : > { %1535 = vmatpush1.bf16.msra.mxu1 %v1534_v15  ;;  %548 = vmatprep.mubr.f32.mxu1 %v2070_v0  ;;  %v376_v15 = vld [vmem:[#allocation5 + $0x280] sm:$0xff] }
  0x81   : > { %1537 = vmatprep.subr.bf16.mxu1 %v1536_v17  ;;  %1567 = vmatpush1.bf16.msra.mxu0 %v1566_v20  ;;  %v1582_v17 = vpack.c.bf16 %v366_v6, %v360_v5  ;;  %v1584_v20 = vpack.c.bf16 %v379_v8, %v373_v7  ;;  %v1554_v26 = vpack.c.bf16 %v376_v15, %v370_v13 }
  0x82   : > { %500 = vmatprep.mubr.f32.mxu0 %v2070_v0  ;;  %1569 = vmatprep.subr.bf16.mxu0 %v1568_v23  ;;  %v385_v23 = vld [vmem:[#allocation5 + $0x2c8] sm:$0xff] }
  0x83   : > { %549 = vmatmul.mubr.f32.gmra.mrb[4].mxu1 %v2275_v28  ;;  %501 = vmatmul.mubr.f32.gmra.mrb[4].mxu0 %v2278_v30 }
  0x84   : > { %1539 = vmatpush1.bf16.msra.mxu1 %v1538_v29  ;;  %554 = vmatprep.mubr.f32.mxu1 %v2070_v0  ;;  %v1556_v29 = vpack.c.bf16 %v389_v19, %v383_v18 }
  0x85   : > { %1541 = vmatprep.subr.bf16.mxu1 %v1540_v31  ;;  %1571 = vmatpush1.bf16.msra.mxu0 %v1570_v34  ;;  %v382_v31 = vld [vmem:[#allocation5 + $0x2b0] sm:$0xff]  ;;  %v1588_v34 = vpack.c.bf16 %v391_v24, %v385_v23 }
  0x86   : > { %506 = vmatprep.mubr.f32.mxu0 %v2070_v0  ;;  %1573 = vmatprep.subr.bf16.mxu0 %v1572_v37  ;;  %v2322_v37 = vld [vmem:[%s2243_s11 + $0x78] sm:$0xff]  ;;  %v1558_v38 = vpack.c.bf16 %v388_v32, %v382_v31  ;;  %s1938_s11 = scalar_lea.vmem %s1937_s29, 8192 }
  0x87   : > { %555 = vmatmul.mubr.f32.gmra.mrb[6].mxu1 %v2285_v42  ;;  %507 = vmatmul.mubr.f32.gmra.mrb[6].mxu0 %v2288_v44  ;;  %p1940_p13 = scmp.lt.s32.totalorder %s1938_s11, %s1932_s8 }
  0x88   : > { %1543 = vmatpush1.bf16.msra.mxu1 %v1542_v43  ;;  %560 = vmatprep.mubr.f32.mxu1 %v2070_v0 }
  0x89   : > { %1545 = vmatprep.subr.bf16.mxu1 %v1544_v45  ;;  %1575 = vmatpush1.bf16.msra.mxu0 %v1574_v48  ;;  %p1941_p3 = por %p1940_p13, %p1939_p8 }
  0x8a   : > { %512 = vmatprep.mubr.f32.mxu0 %v2070_v0  ;;  %1577 = vmatprep.subr.bf16.mxu0 %v1576_v51 }
  0x8b   : > { %561 = vmatmul.mubr.f32.gmra.mrb[8].mxu1 %v2295_v56  ;;  %513 = vmatmul.mubr.f32.gmra.mrb[8].mxu0 %v2298_v58  ;;  %p1942_p7 = pnand %p1941_p3, %p1935_p6 }
  0x8c   : > { %1547 = vmatpush1.bf16.msra.mxu1 %v1546_v57  ;;  %566 = vmatprep.mubr.f32.mxu1 %v2070_v0 }
  0x8d   : > { %1549 = vmatprep.subr.bf16.mxu1 %v1548_v59  ;;  %1579 = vmatpush1.bf16.msra.mxu0 %v1578_v62 }
  0x8e   : > { %518 = vmatprep.mubr.f32.mxu0 %v2070_v0  ;;  %1581 = vmatprep.subr.bf16.mxu0 %v1580_v4 }
  0x8f   : > { %567 = vmatmul.mubr.f32.gmra.mrb[10].mxu1 %v2305_v9  ;;  %519 = vmatmul.mubr.f32.gmra.mrb[10].mxu0 %v2308_v11 }
  0x90   : > { %1551 = vmatpush1.bf16.msra.mxu1 %v1550_v10  ;;  %572 = vmatprep.mubr.f32.mxu1 %v2070_v0 }
  0x91   : > { %1553 = vmatprep.subr.bf16.mxu1 %v1552_v12  ;;  %1583 = vmatpush1.bf16.msra.mxu0 %v1582_v17 }
  0x92   : > { %524 = vmatprep.mubr.f32.mxu0 %v2070_v0  ;;  %1585 = vmatprep.subr.bf16.mxu0 %v1584_v20 }
  0x93   : > { %573 = vmatmul.mubr.f32.gmra.mrb[12].mxu1 %v2315_v25  ;;  %525 = vmatmul.mubr.f32.gmra.mrb[12].mxu0 %v286_v27 }
  0x94   : > { %1555 = vmatpush1.bf16.msra.mxu1 %v1554_v26  ;;  %578 = vmatprep.mubr.f32.mxu1 %v2070_v0 }
  0x95   : > { %1557 = vmatprep.subr.bf16.mxu1 %v1556_v29  ;;  %1587 = vmatpush1.bf16.msra.mxu0 %v1586_v33 }
  0x96   : > { %530 = vmatprep.mubr.f32.mxu0 %v2070_v0  ;;  %1589 = vmatprep.subr.bf16.mxu0 %v1588_v34 }
  0x97   : > { %579 = vmatmul.mubr.f32.gmra.mrb[14].mxu1 %v2322_v37  ;;  %531 = vmatmul.mubr.f32.gmra.mrb[14].mxu0 %v287_v39 }
  0x98   : > { %1559 = vmatpush1.bf16.msra.mxu1 %v1558_v38  ;;  %649 = vmatprep.mubr.f32.mxu1 %v2070_v0 }
  0x99   : > { %1591 = vmatpush1.bf16.msra.mxu0 %v1590_v40  ;;  %810 = vmatprep.mubr.f32.mxu0 %v2070_v0 }
  0x9b   : > { %650 = vmatmul.mubr.f32.vlgmr.msra.gmra.mrb[16].mxu1 %v2259_v2 }
  0x9c   : > { %655 = vmatprep.mubr.f32.mxu1 %v2070_v0  ;;  %811 = vmatmul.mubr.f32.vlgmr.msra.gmra.mrb[16].mxu0 %v2259_v2 }
  0x9d   : > { %816 = vmatprep.mubr.f32.mxu0 %v2070_v0 }
  0x9f   : > { %656 = vmatmul.mubr.f32.gmra.mrb[18].mxu1 %v2268_v16 }
  0xa0   : > { %661 = vmatprep.mubr.f32.mxu1 %v2070_v0  ;;  %817 = vmatmul.mubr.f32.gmra.mrb[18].mxu0 %v2268_v16  ;;  %v2393_v16 = vld [vmem:[%s2753_s2] sm:$0x3f] }
  0xa1   : > { %822 = vmatprep.mubr.f32.mxu0 %v2070_v0 }
  0xa3   : > { %662 = vmatmul.mubr.f32.gmra.mrb[20].mxu1 %v2278_v30 }
  0xa4   : > { %667 = vmatprep.mubr.f32.mxu1 %v2070_v0  ;;  %823 = vmatmul.mubr.f32.gmra.mrb[20].mxu0 %v2278_v30 }
  0xa5   : > { %828 = vmatprep.mubr.f32.mxu0 %v2070_v0 }
  0xa7   : > { %668 = vmatmul.mubr.f32.gmra.mrb[22].mxu1 %v2288_v44 }
  0xa8   : > { %673 = vmatprep.mubr.f32.mxu1 %v2070_v0  ;;  %829 = vmatmul.mubr.f32.gmra.mrb[22].mxu0 %v2288_v44 }
  0xa9   : > { %834 = vmatprep.mubr.f32.mxu0 %v2070_v0 }
  0xab   : > { %674 = vmatmul.mubr.f32.gmra.mrb[24].mxu1 %v2298_v58 }
  0xac   : > { %679 = vmatprep.mubr.f32.mxu1 %v2070_v0  ;;  %835 = vmatmul.mubr.f32.gmra.mrb[24].mxu0 %v2298_v58 }
  0xad   : > { %840 = vmatprep.mubr.f32.mxu0 %v2070_v0 }
  0xaf   : > { %680 = vmatmul.mubr.f32.gmra.mrb[26].mxu1 %v2308_v11 }
  0xb0   : > { %685 = vmatprep.mubr.f32.mxu1 %v2070_v0  ;;  %841 = vmatmul.mubr.f32.gmra.mrb[26].mxu0 %v2308_v11 }
  0xb1   : > { %846 = vmatprep.mubr.f32.mxu0 %v2070_v0 }
  0xb3   : > { %686 = vmatmul.mubr.f32.gmra.mrb[28].mxu1 %v286_v27 }
  0xb4   : > { %691 = vmatprep.mubr.f32.mxu1 %v2070_v0  ;;  %847 = vmatmul.mubr.f32.gmra.mrb[28].mxu0 %v286_v27 }
  0xb5   : > { %852 = vmatprep.mubr.f32.mxu0 %v2070_v0 }
  0xb7   : > { %692 = vmatmul.mubr.f32.gmra.mrb[30].mxu1 %v287_v39 }
  0xb8   : > { %697 = vmatprep.mubr.f32.mxu1 %v2070_v0  ;;  %853 = vmatmul.mubr.f32.gmra.mrb[30].mxu0 %v287_v39 }
  0xb9   : > { %858 = vmatprep.mubr.f32.mxu0 %v2070_v0 }
  0xbb   : > { %698 = vmatmul.mubr.f32.gmra.mrb[32].mxu1 %v2256_v63 }
  0xbc   : > { %703 = vmatprep.mubr.f32.mxu1 %v2070_v0  ;;  %859 = vmatmul.mubr.f32.gmra.mrb[32].mxu0 %v2256_v63  ;;  %v394_v63 = vlaneseq }
  0xbd   : > { %864 = vmatprep.mubr.f32.mxu0 %v2070_v0 }
  0xbe   : > { %v2387_v2 = vshrl.u32 %v394_v63, 7 }
  0xbf   : > { %704 = vmatmul.mubr.f32.gmra.mrb[34].mxu1 %v2265_v14 }
  0xc0   : > { %709 = vmatprep.mubr.f32.mxu1 %v2070_v0  ;;  %865 = vmatmul.mubr.f32.gmra.mrb[34].mxu0 %v2265_v14  ;;  %v396_v14 = vsub.s32 0, %v2387_v2 }
  0xc1   : > { %870 = vmatprep.mubr.f32.mxu0 %v2070_v0 }
  0xc2   : > { %v2397_v30 = vrot.slane %v2393_v16, %v396_v14 }
  0xc3   : > { %710 = vmatmul.mubr.f32.gmra.mrb[36].mxu1 %v2275_v28 }
  0xc4   : > { %715 = vmatprep.mubr.f32.mxu1 %v2070_v0  ;;  %871 = vmatmul.mubr.f32.gmra.mrb[36].mxu0 %v2275_v28  ;;  %v400_v28 = vsub.s32 1, %v2387_v2 }
  0xc5   : > { %876 = vmatprep.mubr.f32.mxu0 %v2070_v0 }
  0xc7   : > { %716 = vmatmul.mubr.f32.gmra.mrb[38].mxu1 %v2285_v42 }
  0xc8   : > { %721 = vmatprep.mubr.f32.mxu1 %v2070_v0  ;;  %877 = vmatmul.mubr.f32.gmra.mrb[38].mxu0 %v2285_v42 }
  0xc9   : > { %882 = vmatprep.mubr.f32.mxu0 %v2070_v0 }
  0xcb   : > { %722 = vmatmul.mubr.f32.gmra.mrb[40].mxu1 %v2295_v56 }
  0xcc   : > { %727 = vmatprep.mubr.f32.mxu1 %v2070_v0  ;;  %883 = vmatmul.mubr.f32.gmra.mrb[40].mxu0 %v2295_v56 }
  0xcd   : > { %888 = vmatprep.mubr.f32.mxu0 %v2070_v0 }
  0xcf   : > { %728 = vmatmul.mubr.f32.gmra.mrb[42].mxu1 %v2305_v9 }
  0xd0   : > { %733 = vmatprep.mubr.f32.mxu1 %v2070_v0  ;;  %889 = vmatmul.mubr.f32.gmra.mrb[42].mxu0 %v2305_v9 }
  0xd1   : > { %894 = vmatprep.mubr.f32.mxu0 %v2070_v0 }
  0xd3   : > { %734 = vmatmul.mubr.f32.gmra.mrb[44].mxu1 %v2315_v25 }
  0xd4   : > { %739 = vmatprep.mubr.f32.mxu1 %v2070_v0  ;;  %895 = vmatmul.mubr.f32.gmra.mrb[44].mxu0 %v2315_v25 }
  0xd5   : > { %900 = vmatprep.mubr.f32.mxu0 %v2070_v0  ;;  %v2400_v0 = vrot.slane %v2393_v16, %v400_v28 }
  0xd7   : > { %740 = vmatmul.mubr.f32.gmra.mrb[46].mxu1 %v2322_v37 }
  0xd8   : > { %901 = vmatmul.mubr.f32.gmra.mrb[46].mxu0 %v2322_v37 }
 0x14e   : > { %v538_v41 = vpop.f32.mrb[0].mxu1  ;;  %v490_v42 = vpop.f32.mrb[0].mxu0 }
 0x14f   : > { %v539_v43 = vadd.f32 %v538_v41, %v2397_v30  ;;  %v540_v44 = vpop.f32.mrb[1].mxu1  ;;  %v491_v45 = vadd.f32 %v490_v42, %v2397_v30  ;;  %v492_v46 = vpop.f32.mrb[1].mxu0 }
 0x150   : > { %v541_v47 = vadd.f32 %v540_v44, %v2400_v0  ;;  %v493_v48 = vadd.f32 %v492_v46, %v2400_v0 }
 0x151   : > { %v939_v49 = vmul.f32 1.442695, %v539_v43  ;;  %v907_v50 = vmul.f32 1.442695, %v491_v45 }
 0x152   : > { %v941_v51 = vmul.f32 1.442695, %v541_v47  ;;  %v544_v52 = vpop.f32.mrb[2].mxu1  ;;  %v909_v53 = vmul.f32 1.442695, %v493_v48  ;;  %v496_v54 = vpop.f32.mrb[2].mxu0 }
 0x153   : > { %1682 = vpow2.f32 %v939_v49  ;;  %v545_v55 = vadd.f32 %v544_v52, %v2397_v30  ;;  %v546_v56 = vpop.f32.mrb[3].mxu1  ;;  %v497_v57 = vadd.f32 %v496_v54, %v2397_v30  ;;  %v498_v58 = vpop.f32.mrb[3].mxu0 }
 0x154   : > { %1684 = vpow2.f32 %v941_v51  ;;  %v547_v59 = vadd.f32 %v546_v56, %v2400_v0  ;;  %v499_v60 = vadd.f32 %v498_v58, %v2400_v0 }
 0x155   : > { %v943_v61 = vmul.f32 1.442695, %v545_v55  ;;  %1686 = vpow2.f32 %v907_v50  ;;  %v911_v62 = vmul.f32 1.442695, %v497_v57 }
 0x156   : > { %v945_v1 = vmul.f32 1.442695, %v547_v59  ;;  %1688 = vpow2.f32 %v909_v53  ;;  %v550_v3 = vpop.f32.mrb[4].mxu1  ;;  %v913_v4 = vmul.f32 1.442695, %v499_v60  ;;  %v502_v5 = vpop.f32.mrb[4].mxu0 }
 0x157   : > { %1690 = vpow2.f32 %v943_v61  ;;  %v551_v6 = vadd.f32 %v550_v3, %v2397_v30  ;;  %v552_v7 = vpop.f32.mrb[5].mxu1  ;;  %v503_v8 = vadd.f32 %v502_v5, %v2397_v30  ;;  %v504_v9 = vpop.f32.mrb[5].mxu0  ;;  %v404_v60 = vsub.s32 2, %v2387_v2 }
 0x158   : > { %1692 = vpow2.f32 %v945_v1  ;;  %v553_v10 = vadd.f32 %v552_v7, %v2400_v0  ;;  %v505_v11 = vadd.f32 %v504_v9, %v2400_v0 }
 0x159   : > { %v947_v12 = vmul.f32 1.442695, %v551_v6  ;;  %1694 = vpow2.f32 %v911_v62  ;;  %v915_v13 = vmul.f32 1.442695, %v503_v8 }
 0x15a   : > { %v949_v15 = vmul.f32 1.442695, %v553_v10  ;;  %1696 = vpow2.f32 %v913_v4  ;;  %v556_v17 = vpop.f32.mrb[6].mxu1  ;;  %v917_v18 = vmul.f32 1.442695, %v505_v11  ;;  %v508_v19 = vpop.f32.mrb[6].mxu0 }
 0x15b   : > { %1698 = vpow2.f32 %v947_v12  ;;  %v557_v20 = vadd.f32 %v556_v17, %v2397_v30  ;;  %v558_v21 = vpop.f32.mrb[7].mxu1  ;;  %v509_v22 = vadd.f32 %v508_v19, %v2397_v30  ;;  %v510_v23 = vpop.f32.mrb[7].mxu0  ;;  %v408_v10 = vsub.s32 3, %v2387_v2 }
 0x15c   : > { %1700 = vpow2.f32 %v949_v15  ;;  %v559_v24 = vadd.f32 %v558_v21, %v2400_v0  ;;  %v511_v25 = vadd.f32 %v510_v23, %v2400_v0  ;;  %v412_v15 = vsub.s32 4, %v2387_v2 }
 0x15d   : > { %v1683_v26 = vpop.eup %1682  ;;  %v951_v27 = vmul.f32 1.442695, %v557_v20  ;;  %1702 = vpow2.f32 %v915_v13  ;;  %v919_v29 = vmul.f32 1.442695, %v509_v22  ;;  %v416_v20 = vsub.s32 5, %v2387_v2 }
 0x15e   : > { %v1685_v31 = vpop.eup %1684  ;;  %987 = vst [vmem:[%s2422_s6 + $0x80] sm:$0xff] %v1683_v26  ;;  %v953_v32 = vmul.f32 1.442695, %v559_v24  ;;  %1704 = vpow2.f32 %v917_v18  ;;  %v562_v33 = vpop.f32.mrb[8].mxu1  ;;  %v921_v34 = vmul.f32 1.442695, %v511_v25  ;;  %v2454_v25 = vrot.slane %v2393_v16, %v404_v60 }
 0x15f   : > { %v514_v35 = vpop.f32.mrb[8].mxu0  ;;  %v1687_v36 = vpop.eup %1686  ;;  %988 = vst [vmem:[%s2422_s6 + $0x88] sm:$0xff] %v1685_v31  ;;  %1706 = vpow2.f32 %v951_v27  ;;  %v563_v37 = vadd.f32 %v562_v33, %v2397_v30 }
 0x160   : > { %v564_v38 = vpop.f32.mrb[9].mxu1  ;;  %v515_v39 = vadd.f32 %v514_v35, %v2397_v30  ;;  %v516_v40 = vpop.f32.mrb[9].mxu0  ;;  %971 = vst [vmem:[%s2422_s6] sm:$0xff] %v1687_v36  ;;  %1708 = vpow2.f32 %v953_v32  ;;  %v2460_v32 = vrot.slane %v2393_v16, %v408_v10 }
 0x161   : > { %v1689_v63 = vpop.eup %1688  ;;  %v565_v14 = vadd.f32 %v564_v38, %v2400_v0  ;;  %v517_v28 = vadd.f32 %v516_v40, %v2400_v0  ;;  %v955_v42 = vmul.f32 1.442695, %v563_v37  ;;  %1710 = vpow2.f32 %v919_v29 }
 0x162   : > { %v1691_v41 = vpop.eup %1690  ;;  %972 = vst [vmem:[%s2422_s6 + $0x8] sm:$0xff] %v1689_v63  ;;  %v923_v43 = vmul.f32 1.442695, %v515_v39  ;;  %1712 = vpow2.f32 %v921_v34  ;;  %v568_v46 = vpop.f32.mrb[10].mxu1  ;;  %v2466_v37 = vrot.slane %v2393_v16, %v412_v15  ;;  %v2470_v40 = vrot.slane %v2393_v16, %v416_v20 }
 0x163   : > { %v1693_v44 = vpop.eup %1692  ;;  %989 = vst [vmem:[%s2422_s6 + $0x90] sm:$0xff] %v1691_v41  ;;  %v957_v45 = vmul.f32 1.442695, %v565_v14  ;;  %v925_v47 = vmul.f32 1.442695, %v517_v28  ;;  %v520_v48 = vpop.f32.mrb[10].mxu0  ;;  %1714 = vpow2.f32 %v955_v42  ;;  %v569_v50 = vadd.f32 %v568_v46, %v2397_v30 }
 0x164   : > { %v1695_v49 = vpop.eup %1694  ;;  %990 = vst [vmem:[%s2422_s6 + $0x98] sm:$0xff] %v1693_v44  ;;  %v570_v51 = vpop.f32.mrb[11].mxu1  ;;  %v521_v52 = vadd.f32 %v520_v48, %v2397_v30 }
 0x165   : > { %v522_v53 = vpop.f32.mrb[11].mxu0  ;;  %v1697_v54 = vpop.eup %1696  ;;  %973 = vst [vmem:[%s2422_s6 + $0x10] sm:$0xff] %v1695_v49  ;;  %1716 = vpow2.f32 %v957_v45  ;;  %v571_v55 = vadd.f32 %v570_v51, %v2400_v0  ;;  %v959_v58 = vmul.f32 1.442695, %v569_v50 }
 0x166   : > { %v523_v56 = vadd.f32 %v522_v53, %v2400_v0  ;;  %v1699_v57 = vpop.eup %1698  ;;  %974 = vst [vmem:[%s2422_s6 + $0x18] sm:$0xff] %v1697_v54  ;;  %1718 = vpow2.f32 %v923_v43  ;;  %v927_v59 = vmul.f32 1.442695, %v521_v52  ;;  %v574_v1 = vpop.f32.mrb[12].mxu1 }
 0x167   : > { %v1701_v61 = vpop.eup %1700  ;;  %991 = vst [vmem:[%s2422_s6 + $0xa0] sm:$0xff] %v1699_v57  ;;  %v961_v62 = vmul.f32 1.442695, %v571_v55  ;;  %1720 = vpow2.f32 %v925_v47  ;;  %v526_v4 = vpop.f32.mrb[12].mxu0  ;;  %v575_v6 = vadd.f32 %v574_v1, %v2397_v30 }
 0x168   : > { %v929_v3 = vmul.f32 1.442695, %v523_v56  ;;  %v1703_v5 = vpop.eup %1702  ;;  %992 = vst [vmem:[%s2422_s6 + $0xa8] sm:$0xff] %v1701_v61  ;;  %1722 = vpow2.f32 %v959_v58  ;;  %v576_v7 = vpop.f32.mrb[13].mxu1  ;;  %v527_v8 = vadd.f32 %v526_v4, %v2397_v30 }
 0x169   : > { %v528_v9 = vpop.f32.mrb[13].mxu0  ;;  %v1705_v11 = vpop.eup %1704  ;;  %975 = vst [vmem:[%s2422_s6 + $0x20] sm:$0xff] %v1703_v5  ;;  %1724 = vpow2.f32 %v961_v62  ;;  %v577_v12 = vadd.f32 %v576_v7, %v2400_v0  ;;  %v963_v18 = vmul.f32 1.442695, %v575_v6 }
 0x16a   : > { %v529_v13 = vadd.f32 %v528_v9, %v2400_v0  ;;  %v1707_v17 = vpop.eup %1706  ;;  %976 = vst [vmem:[%s2422_s6 + $0x28] sm:$0xff] %v1705_v11  ;;  %1726 = vpow2.f32 %v927_v59  ;;  %v931_v19 = vmul.f32 1.442695, %v527_v8  ;;  %v580_v23 = vpop.f32.mrb[14].mxu1 }
 0x16b   : > { %v1709_v21 = vpop.eup %1708  ;;  %993 = vst [vmem:[%s2422_s6 + $0xb0] sm:$0xff] %v1707_v17  ;;  %v965_v22 = vmul.f32 1.442695, %v577_v12  ;;  %1728 = vpow2.f32 %v929_v3  ;;  %v532_v26 = vpop.f32.mrb[14].mxu0  ;;  %v581_v29 = vadd.f32 %v580_v23, %v2397_v30 }
 0x16c   : > { %v933_v24 = vmul.f32 1.442695, %v529_v13  ;;  %v1711_v27 = vpop.eup %1710  ;;  %994 = vst [vmem:[%s2422_s6 + $0xb8] sm:$0xff] %v1709_v21  ;;  %1730 = vpow2.f32 %v963_v18  ;;  %v582_v31 = vpop.f32.mrb[15].mxu1  ;;  %v533_v2 = vadd.f32 %v532_v26, %v2397_v30 }
 0x16d   : > { %v534_v33 = vpop.f32.mrb[15].mxu0  ;;  %v1713_v34 = vpop.eup %1712  ;;  %977 = vst [vmem:[%s2422_s6 + $0x30] sm:$0xff] %v1711_v27  ;;  %1732 = vpow2.f32 %v965_v22  ;;  %v583_v35 = vadd.f32 %v582_v31, %v2400_v0  ;;  %v967_v39 = vmul.f32 1.442695, %v581_v29 }
 0x16e   : > { %v535_v36 = vadd.f32 %v534_v33, %v2400_v0  ;;  %v1715_v38 = vpop.eup %1714  ;;  %978 = vst [vmem:[%s2422_s6 + $0x38] sm:$0xff] %v1713_v34  ;;  %1734 = vpow2.f32 %v931_v19  ;;  %v935_v30 = vmul.f32 1.442695, %v533_v2  ;;  %v651_v28 = vpop.f32.mrb[16].mxu1 }
 0x16f   : > { %v1717_v63 = vpop.eup %1716  ;;  %995 = vst [vmem:[%s2422_s6 + $0xc0] sm:$0xff] %v1715_v38  ;;  %v969_v14 = vmul.f32 1.442695, %v583_v35  ;;  %1736 = vpow2.f32 %v933_v24  ;;  %v652_v42 = vadd.f32 %v651_v28, %v2454_v25  ;;  %v653_v43 = vpop.f32.mrb[17].mxu1 }
 0x170   : > { %v937_v41 = vmul.f32 1.442695, %v535_v36  ;;  %v1719_v0 = vpop.eup %1718  ;;  %996 = vst [vmem:[%s2422_s6 + $0xc8] sm:$0xff] %v1717_v63  ;;  %1738 = vpow2.f32 %v967_v39  ;;  %v812_v44 = vpop.f32.mrb[16].mxu0  ;;  %v654_v16 = vadd.f32 %v653_v43, %v2460_v32 }
 0x171   : > { %v1721_v45 = vpop.eup %1720  ;;  %979 = vst [vmem:[%s2422_s6 + $0x40] sm:$0xff] %v1719_v0  ;;  %1740 = vpow2.f32 %v969_v14  ;;  %v813_v46 = vadd.f32 %v812_v44, %v2466_v37  ;;  %v814_v47 = vpop.f32.mrb[17].mxu0  ;;  %v1003_v49 = vmul.f32 0.5, %v652_v42 }
 0x172   : > { %v1723_v48 = vpop.eup %1722  ;;  %980 = vst [vmem:[%s2422_s6 + $0x48] sm:$0xff] %v1721_v45  ;;  %1742 = vpow2.f32 %v935_v30  ;;  %v815_v50 = vadd.f32 %v814_v47, %v2470_v40  ;;  %v1004_v52 = vmul.f32 0.5, %v654_v16  ;;  %v657_v53 = vpop.f32.mrb[18].mxu1 }
 0x173   : > { %v1725_v51 = vpop.eup %1724  ;;  %997 = vst [vmem:[%s2422_s6 + $0xd0] sm:$0xff] %v1723_v48  ;;  %1744 = vpow2.f32 %v937_v41  ;;  %v1163_v54 = vmul.f32 1.442695, %v813_v46  ;;  %v658_v56 = vadd.f32 %v657_v53, %v2454_v25  ;;  %v659_v57 = vpop.f32.mrb[19].mxu1 }
 0x174   : > { %v1727_v55 = vpop.eup %1726  ;;  %998 = vst [vmem:[%s2422_s6 + $0xd8] sm:$0xff] %v1725_v51  ;;  %1746 = vtanh.f32 %v1003_v49  ;;  %v1165_v58 = vmul.f32 1.442695, %v815_v50  ;;  %v818_v59 = vpop.f32.mrb[18].mxu0  ;;  %v660_v61 = vadd.f32 %v659_v57, %v2460_v32 }
 0x175   : > { %v1729_v60 = vpop.eup %1728  ;;  %981 = vst [vmem:[%s2422_s6 + $0x50] sm:$0xff] %v1727_v55  ;;  %1748 = vtanh.f32 %v1004_v52  ;;  %v819_v62 = vadd.f32 %v818_v59, %v2466_v37  ;;  %v820_v1 = vpop.f32.mrb[19].mxu0  ;;  %v1005_v4 = vmul.f32 0.5, %v658_v56 }
 0x176   : > { %v1731_v3 = vpop.eup %1730  ;;  %982 = vst [vmem:[%s2422_s6 + $0x58] sm:$0xff] %v1729_v60  ;;  %1750 = vpow2.f32 %v1163_v54  ;;  %v821_v5 = vadd.f32 %v820_v1, %v2470_v40  ;;  %v1006_v7 = vmul.f32 0.5, %v660_v61  ;;  %v663_v8 = vpop.f32.mrb[20].mxu1 }
 0x177   : > { %v1733_v6 = vpop.eup %1732  ;;  %999 = vst [vmem:[%s2422_s6 + $0xe0] sm:$0xff] %v1731_v3  ;;  %1752 = vpow2.f32 %v1165_v58  ;;  %v1167_v9 = vmul.f32 1.442695, %v819_v62  ;;  %v664_v11 = vadd.f32 %v663_v8, %v2454_v25  ;;  %v665_v12 = vpop.f32.mrb[21].mxu1 }
 0x178   : > { %v1735_v10 = vpop.eup %1734  ;;  %1000 = vst [vmem:[%s2422_s6 + $0xe8] sm:$0xff] %v1733_v6  ;;  %1754 = vtanh.f32 %v1005_v4  ;;  %v1169_v13 = vmul.f32 1.442695, %v821_v5  ;;  %v824_v15 = vpop.f32.mrb[20].mxu0  ;;  %v666_v18 = vadd.f32 %v665_v12, %v2460_v32 }
 0x179   : > { %v1737_v17 = vpop.eup %1736  ;;  %983 = vst [vmem:[%s2422_s6 + $0x60] sm:$0xff] %v1735_v10  ;;  %1756 = vtanh.f32 %v1006_v7  ;;  %v825_v19 = vadd.f32 %v824_v15, %v2466_v37  ;;  %v826_v20 = vpop.f32.mrb[21].mxu0  ;;  %v1007_v22 = vmul.f32 0.5, %v664_v11 }
 0x17a   : > { %v1739_v21 = vpop.eup %1738  ;;  %984 = vst [vmem:[%s2422_s6 + $0x68] sm:$0xff] %v1737_v17  ;;  %1758 = vpow2.f32 %v1167_v9  ;;  %v827_v23 = vadd.f32 %v826_v20, %v2470_v40  ;;  %v1008_v26 = vmul.f32 0.5, %v666_v18  ;;  %v669_v27 = vpop.f32.mrb[22].mxu1 }
 0x17b   : > { %v1741_v24 = vpop.eup %1740  ;;  %1001 = vst [vmem:[%s2422_s6 + $0xf0] sm:$0xff] %v1739_v21  ;;  %1760 = vpow2.f32 %v1169_v13  ;;  %v1171_v29 = vmul.f32 1.442695, %v825_v19  ;;  %v670_v2 = vadd.f32 %v669_v27, %v2454_v25  ;;  %v671_v33 = vpop.f32.mrb[23].mxu1 }
 0x17c   : > { %v1743_v31 = vpop.eup %1742  ;;  %1002 = vst [vmem:[%s2422_s6 + $0xf8] sm:$0xff] %v1741_v24  ;;  %1762 = vtanh.f32 %v1007_v22  ;;  %v1173_v34 = vmul.f32 1.442695, %v827_v23  ;;  %v830_v35 = vpop.f32.mrb[22].mxu0  ;;  %v672_v38 = vadd.f32 %v671_v33, %v2460_v32 }
 0x17d   : > { %v1745_v36 = vpop.eup %1744  ;;  %985 = vst [vmem:[%s2422_s6 + $0x70] sm:$0xff] %v1743_v31  ;;  %1764 = vtanh.f32 %v1008_v26  ;;  %v831_v39 = vadd.f32 %v830_v35, %v2466_v37  ;;  %v832_v30 = vpop.f32.mrb[23].mxu0  ;;  %v1009_v14 = vmul.f32 0.5, %v670_v2 }
 0x17e   : > { %v1747_v63 = vpop.eup %1746  ;;  %986 = vst [vmem:[%s2422_s6 + $0x78] sm:$0xff] %v1745_v36  ;;  %1766 = vpow2.f32 %v1171_v29  ;;  %v833_v28 = vadd.f32 %v832_v30, %v2470_v40  ;;  %v1010_v42 = vmul.f32 0.5, %v672_v38  ;;  %v675_v43 = vpop.f32.mrb[24].mxu1 }
 0x17f   : > { %v1749_v41 = vpop.eup %1748  ;;  %v1067_v0 = vmul.f32 0.5, %v1747_v63  ;;  %1768 = vpow2.f32 %v1173_v34  ;;  %v1175_v44 = vmul.f32 1.442695, %v831_v39 }
 0x180   : > { %1945 = shalt.err (!%p1942_p7)
}
 0x181   : > { %s1946_s24 = scalar_lea.hbm %s2507_s27, 4096  ;;  %s1950_s14 = scalar_lea.hbm %s2754_s3, 16384 }
 0x182   : > { %p1947_p9 = scmp.ne.s32.totalorder %s2507_s27, %s1946_s24  ;;  %p1951_p5 = scmp.lt.u32.totalorder %s2507_s27, %s2754_s3 }
 0x183   : > { %p1952_p10 = scmp.lt.u32.totalorder %s1950_s14, %s1946_s24  ;;  %p1954_p1 = scmp.lt.u32.totalorder %s1946_s24, %s2507_s27 }
 0x184   : > { %p1948_p11 = pnand %p1947_p9, %p2191_p12 }
 0x185   : > { %p1953_p2 = por %p1952_p10, %p1951_p5 }
 0x186   : > { %p1949_p0 = pneg %p1948_p11 }
 0x187   : > { %p1955_p4 = por %p1954_p1, %p1953_p2 }
 0x189   : > { %p1956_p6 = pnand %p1955_p4, %p1949_p0 }
 0x18b   : > { %1959 = shalt.err (!%p1956_p6)
}
 0x18c   : > { %s2072_s8 = smov 256   ;;  %s2073_s29 = smov 16   ;;  %v1751_v45 = vpop.eup %1750  ;;  %v1068_v16 = vmul.f32 0.5, %v1749_v41  ;;  %1770 = vtanh.f32 %v1009_v14  ;;  %v676_v46 = vadd.f32 %v675_v43, %v2454_v25  ;;  %v677_v47 = vpop.f32.mrb[25].mxu1  ;;  %v1177_v48 = vmul.f32 1.442695, %v833_v28 }
 0x18d   : > { %1614 = dma.vmem_to_hbm [thread:$0]  (%p2191_p12), %s2509_s16, 4096, %s2507_s27, %s1260_s17, %s2072_s8, %s2072_s8, %s2073_s29   ;;  %v836_v49 = vpop.f32.mrb[24].mxu0  ;;  %v1753_v50 = vpop.eup %1752  ;;  %v1099_v51 = vadd.f32 0.5, %v1067_v0  ;;  %1772 = vtanh.f32 %v1010_v42  ;;  %v678_v52 = vadd.f32 %v677_v47, %v2460_v32 }
 0x18e   : > { %s2545_s11 = scalar_lea.vmem [#allocation10], %s2413_s15  ;;  %v837_v53 = vadd.f32 %v836_v49, %v2466_v37  ;;  %v838_v54 = vpop.f32.mrb[25].mxu0  ;;  %v1755_v55 = vpop.eup %1754  ;;  %v1100_v56 = vadd.f32 0.5, %v1068_v16  ;;  %v1011_v57 = vmul.f32 0.5, %v676_v46  ;;  %1774 = vpow2.f32 %v1175_v44  ;;  %s2553_s12 = scalar_lea.vmem [#allocation8], %s2413_s15 }
 0x18f   : > { %1227 = vst [vmem:[%s2545_s11] sm:$0xff] %v1751_v45  ;;  %1228 = vst [vmem:[%s2545_s11 + $0x8] sm:$0xff] %v1753_v50  ;;  %v839_v58 = vadd.f32 %v838_v54, %v2470_v40  ;;  %v1757_v59 = vpop.eup %1756  ;;  %v1069_v60 = vmul.f32 0.5, %v1755_v55  ;;  %v1012_v61 = vmul.f32 0.5, %v678_v52  ;;  %1776 = vpow2.f32 %v1177_v48  ;;  %v681_v62 = vpop.f32.mrb[26].mxu1  ;;  %s1264_s15 = sand.u32 1, %s2127_s22   ;;  %s1301_s16 = sshll.u32 %s2553_s12, 4  ;;  %s2668_s16 = int_to_ptr.vmem [resolvable:$true] %s1301_s16 }
 0x190   : > { %1131 = vst [vmem:[%s2553_s12] sm:$0xff] %v1099_v51  ;;  %v1179_v1 = vmul.f32 1.442695, %v837_v53  ;;  %v1759_v3 = vpop.eup %1758  ;;  %1132 = vst [vmem:[%s2553_s12 + $0x8] sm:$0xff] %v1100_v56  ;;  %v1070_v4 = vmul.f32 0.5, %v1757_v59  ;;  %1778 = vtanh.f32 %v1011_v57  ;;  %v682_v5 = vadd.f32 %v681_v62, %v2454_v25  ;;  %v683_v6 = vpop.f32.mrb[27].mxu1  ;;  %s1318_s27 = sshll.u32 %s2545_s11, 4  ;;  %s2666_s22 = scalar_lea.hbm %s2755_s4, %s2495_s7  ;;  %s2677_s27 = int_to_ptr.vmem [resolvable:$true] %s1318_s27 }
 0x191   : > { %v1181_v7 = vmul.f32 1.442695, %v839_v58  ;;  %v842_v8 = vpop.f32.mrb[26].mxu0  ;;  %v1761_v9 = vpop.eup %1760  ;;  %v1101_v10 = vadd.f32 0.5, %v1069_v60  ;;  %1229 = vst [vmem:[%s2545_s11 + $0x10] sm:$0xff] %v1759_v3  ;;  %1780 = vtanh.f32 %v1012_v61  ;;  %v684_v11 = vadd.f32 %v683_v6, %v2460_v32  ;;  %s2675_s14 = scalar_lea.hbm %s2756_s5, %s2495_s7  ;;  %s2680_s28 = scalar_lea.sflag [#allocation9], %s1264_s15 }
 0x192   : > { %v843_v12 = vadd.f32 %v842_v8, %v2466_v37  ;;  %v844_v13 = vpop.f32.mrb[27].mxu0  ;;  %v1763_v15 = vpop.eup %1762  ;;  %v1102_v17 = vadd.f32 0.5, %v1070_v4  ;;  %1230 = vst [vmem:[%s2545_s11 + $0x18] sm:$0xff] %v1761_v9  ;;  %v1013_v18 = vmul.f32 0.5, %v682_v5  ;;  %1782 = vpow2.f32 %v1179_v1  ;;  %s1960_s13 = scalar_lea.vmem %s2668_s16, 4096 }
 0x193   : > { %v845_v19 = vadd.f32 %v844_v13, %v2470_v40  ;;  %v1765_v20 = vpop.eup %1764  ;;  %1133 = vst [vmem:[%s2553_s12 + $0x10] sm:$0xff] %v1101_v10  ;;  %v1071_v21 = vmul.f32 0.5, %v1763_v15  ;;  %v1014_v22 = vmul.f32 0.5, %v684_v11  ;;  %1784 = vpow2.f32 %v1181_v7  ;;  %v687_v23 = vpop.f32.mrb[28].mxu1  ;;  %p1961_p8 = scmp.ne.s32.totalorder %s2668_s16, %s1960_s13 }
 0x194   : > { %v1183_v24 = vmul.f32 1.442695, %v843_v12  ;;  %v1767_v26 = vpop.eup %1766  ;;  %1134 = vst [vmem:[%s2553_s12 + $0x18] sm:$0xff] %v1102_v17  ;;  %v1072_v27 = vmul.f32 0.5, %v1765_v20  ;;  %1786 = vtanh.f32 %v1013_v18  ;;  %v688_v29 = vadd.f32 %v687_v23, %v2454_v25  ;;  %v689_v31 = vpop.f32.mrb[29].mxu1 }
 0x195   : > { %v1185_v2 = vmul.f32 1.442695, %v845_v19  ;;  %v848_v33 = vpop.f32.mrb[28].mxu0  ;;  %v1769_v34 = vpop.eup %1768  ;;  %v1103_v35 = vadd.f32 0.5, %v1071_v21  ;;  %1231 = vst [vmem:[%s2545_s11 + $0x20] sm:$0xff] %v1767_v26  ;;  %1788 = vtanh.f32 %v1014_v22  ;;  %v690_v36 = vadd.f32 %v689_v31, %v2460_v32  ;;  %p1962_p13 = pnand %p1961_p8, %p2191_p12 }
 0x196   : > { %v849_v38 = vadd.f32 %v848_v33, %v2466_v37  ;;  %v850_v39 = vpop.f32.mrb[29].mxu0  ;;  %v1771_v30 = vpop.eup %1770  ;;  %v1104_v63 = vadd.f32 0.5, %v1072_v27  ;;  %1232 = vst [vmem:[%s2545_s11 + $0x28] sm:$0xff] %v1769_v34  ;;  %v1015_v14 = vmul.f32 0.5, %v688_v29  ;;  %1790 = vpow2.f32 %v1183_v24 }
 0x197   : > { %v851_v28 = vadd.f32 %v850_v39, %v2470_v40  ;;  %v1773_v41 = vpop.eup %1772  ;;  %1135 = vst [vmem:[%s2553_s12 + $0x20] sm:$0xff] %v1103_v35  ;;  %v1073_v0 = vmul.f32 0.5, %v1771_v30  ;;  %v1016_v42 = vmul.f32 0.5, %v690_v36  ;;  %1792 = vpow2.f32 %v1185_v2  ;;  %v693_v43 = vpop.f32.mrb[30].mxu1  ;;  %p1963_p3 = pneg %p1962_p13 }
 0x198   : > { %v1187_v44 = vmul.f32 1.442695, %v849_v38  ;;  %v1775_v45 = vpop.eup %1774  ;;  %1136 = vst [vmem:[%s2553_s12 + $0x28] sm:$0xff] %v1104_v63  ;;  %v1074_v16 = vmul.f32 0.5, %v1773_v41  ;;  %1794 = vtanh.f32 %v1015_v14  ;;  %v694_v46 = vadd.f32 %v693_v43, %v2454_v25  ;;  %v695_v47 = vpop.f32.mrb[31].mxu1 }
 0x199   : > { %v1189_v48 = vmul.f32 1.442695, %v851_v28  ;;  %v854_v49 = vpop.f32.mrb[30].mxu0  ;;  %v1777_v50 = vpop.eup %1776  ;;  %v1105_v51 = vadd.f32 0.5, %v1073_v0  ;;  %1233 = vst [vmem:[%s2545_s11 + $0x30] sm:$0xff] %v1775_v45  ;;  %1796 = vtanh.f32 %v1016_v42  ;;  %v696_v52 = vadd.f32 %v695_v47, %v2460_v32 }
 0x19a   : > { %v855_v53 = vadd.f32 %v854_v49, %v2466_v37  ;;  %v856_v54 = vpop.f32.mrb[31].mxu0  ;;  %v1779_v55 = vpop.eup %1778  ;;  %v1106_v56 = vadd.f32 0.5, %v1074_v16  ;;  %1234 = vst [vmem:[%s2545_s11 + $0x38] sm:$0xff] %v1777_v50  ;;  %v1017_v57 = vmul.f32 0.5, %v694_v46  ;;  %1798 = vpow2.f32 %v1187_v44 }
 0x19b   : > { %v857_v58 = vadd.f32 %v856_v54, %v2470_v40  ;;  %v1781_v59 = vpop.eup %1780  ;;  %1137 = vst [vmem:[%s2553_s12 + $0x30] sm:$0xff] %v1105_v51  ;;  %v1075_v60 = vmul.f32 0.5, %v1779_v55  ;;  %v1018_v61 = vmul.f32 0.5, %v696_v52  ;;  %1800 = vpow2.f32 %v1189_v48  ;;  %v699_v62 = vpop.f32.mrb[32].mxu1 }
 0x19c   : > { %v1191_v1 = vmul.f32 1.442695, %v855_v53  ;;  %v1783_v3 = vpop.eup %1782  ;;  %1138 = vst [vmem:[%s2553_s12 + $0x38] sm:$0xff] %v1106_v56  ;;  %v1076_v4 = vmul.f32 0.5, %v1781_v59  ;;  %1802 = vtanh.f32 %v1017_v57  ;;  %v700_v5 = vadd.f32 %v699_v62, %v2454_v25  ;;  %v701_v6 = vpop.f32.mrb[33].mxu1 }
 0x19d   : > { %v1193_v7 = vmul.f32 1.442695, %v857_v58  ;;  %v860_v8 = vpop.f32.mrb[32].mxu0  ;;  %v1785_v9 = vpop.eup %1784  ;;  %v1107_v10 = vadd.f32 0.5, %v1075_v60  ;;  %1235 = vst [vmem:[%s2545_s11 + $0x40] sm:$0xff] %v1783_v3  ;;  %1804 = vtanh.f32 %v1018_v61  ;;  %v702_v11 = vadd.f32 %v701_v6, %v2460_v32 }
 0x19e   : > { %v861_v12 = vadd.f32 %v860_v8, %v2466_v37  ;;  %v862_v13 = vpop.f32.mrb[33].mxu0  ;;  %v1787_v15 = vpop.eup %1786  ;;  %v1108_v17 = vadd.f32 0.5, %v1076_v4  ;;  %1236 = vst [vmem:[%s2545_s11 + $0x48] sm:$0xff] %v1785_v9  ;;  %v1019_v18 = vmul.f32 0.5, %v700_v5  ;;  %1806 = vpow2.f32 %v1191_v1 }
 0x19f   : > { %v863_v19 = vadd.f32 %v862_v13, %v2470_v40  ;;  %v1789_v20 = vpop.eup %1788  ;;  %1139 = vst [vmem:[%s2553_s12 + $0x40] sm:$0xff] %v1107_v10  ;;  %v1077_v21 = vmul.f32 0.5, %v1787_v15  ;;  %v1020_v22 = vmul.f32 0.5, %v702_v11  ;;  %1808 = vpow2.f32 %v1193_v7  ;;  %v705_v23 = vpop.f32.mrb[34].mxu1 }
 0x1a0   : > { %v1195_v24 = vmul.f32 1.442695, %v861_v12  ;;  %v1791_v26 = vpop.eup %1790  ;;  %1140 = vst [vmem:[%s2553_s12 + $0x48] sm:$0xff] %v1108_v17  ;;  %v1078_v27 = vmul.f32 0.5, %v1789_v20  ;;  %1810 = vtanh.f32 %v1019_v18  ;;  %v706_v29 = vadd.f32 %v705_v23, %v2454_v25  ;;  %v707_v31 = vpop.f32.mrb[35].mxu1 }
 0x1a1   : > { %v1197_v2 = vmul.f32 1.442695, %v863_v19  ;;  %v866_v33 = vpop.f32.mrb[34].mxu0  ;;  %v1793_v34 = vpop.eup %1792  ;;  %v1109_v35 = vadd.f32 0.5, %v1077_v21  ;;  %1237 = vst [vmem:[%s2545_s11 + $0x50] sm:$0xff] %v1791_v26  ;;  %1812 = vtanh.f32 %v1020_v22  ;;  %v708_v36 = vadd.f32 %v707_v31, %v2460_v32 }
 0x1a2   : > { %v867_v38 = vadd.f32 %v866_v33, %v2466_v37  ;;  %v868_v39 = vpop.f32.mrb[35].mxu0  ;;  %v1795_v30 = vpop.eup %1794  ;;  %v1110_v63 = vadd.f32 0.5, %v1078_v27  ;;  %1238 = vst [vmem:[%s2545_s11 + $0x58] sm:$0xff] %v1793_v34  ;;  %v1021_v14 = vmul.f32 0.5, %v706_v29  ;;  %1814 = vpow2.f32 %v1195_v24 }
 0x1a3   : > { %v869_v28 = vadd.f32 %v868_v39, %v2470_v40  ;;  %v1797_v41 = vpop.eup %1796  ;;  %1141 = vst [vmem:[%s2553_s12 + $0x50] sm:$0xff] %v1109_v35  ;;  %v1079_v0 = vmul.f32 0.5, %v1795_v30  ;;  %v1022_v42 = vmul.f32 0.5, %v708_v36  ;;  %1816 = vpow2.f32 %v1197_v2  ;;  %v711_v43 = vpop.f32.mrb[36].mxu1 }
 0x1a4   : > { %v1199_v44 = vmul.f32 1.442695, %v867_v38  ;;  %v1799_v45 = vpop.eup %1798  ;;  %1142 = vst [vmem:[%s2553_s12 + $0x58] sm:$0xff] %v1110_v63  ;;  %v1080_v16 = vmul.f32 0.5, %v1797_v41  ;;  %1818 = vtanh.f32 %v1021_v14  ;;  %v712_v46 = vadd.f32 %v711_v43, %v2454_v25  ;;  %v713_v47 = vpop.f32.mrb[37].mxu1 }
 0x1a5   : > { %v1201_v48 = vmul.f32 1.442695, %v869_v28  ;;  %v872_v49 = vpop.f32.mrb[36].mxu0  ;;  %v1801_v50 = vpop.eup %1800  ;;  %v1111_v51 = vadd.f32 0.5, %v1079_v0  ;;  %1239 = vst [vmem:[%s2545_s11 + $0x60] sm:$0xff] %v1799_v45  ;;  %1820 = vtanh.f32 %v1022_v42  ;;  %v714_v52 = vadd.f32 %v713_v47, %v2460_v32 }
 0x1a6   : > { %v873_v53 = vadd.f32 %v872_v49, %v2466_v37  ;;  %v874_v54 = vpop.f32.mrb[37].mxu0  ;;  %v1803_v55 = vpop.eup %1802  ;;  %v1112_v56 = vadd.f32 0.5, %v1080_v16  ;;  %1240 = vst [vmem:[%s2545_s11 + $0x68] sm:$0xff] %v1801_v50  ;;  %v1023_v57 = vmul.f32 0.5, %v712_v46  ;;  %1822 = vpow2.f32 %v1199_v44 }
 0x1a7   : > { %v875_v58 = vadd.f32 %v874_v54, %v2470_v40  ;;  %v1805_v59 = vpop.eup %1804  ;;  %1143 = vst [vmem:[%s2553_s12 + $0x60] sm:$0xff] %v1111_v51  ;;  %v1081_v60 = vmul.f32 0.5, %v1803_v55  ;;  %v1024_v61 = vmul.f32 0.5, %v714_v52  ;;  %1824 = vpow2.f32 %v1201_v48  ;;  %v717_v62 = vpop.f32.mrb[38].mxu1 }
 0x1a8   : > { %v1203_v1 = vmul.f32 1.442695, %v873_v53  ;;  %v1807_v3 = vpop.eup %1806  ;;  %1144 = vst [vmem:[%s2553_s12 + $0x68] sm:$0xff] %v1112_v56  ;;  %v1082_v4 = vmul.f32 0.5, %v1805_v59  ;;  %1826 = vtanh.f32 %v1023_v57  ;;  %v718_v5 = vadd.f32 %v717_v62, %v2454_v25  ;;  %v719_v6 = vpop.f32.mrb[39].mxu1 }
 0x1a9   : > { %v1205_v7 = vmul.f32 1.442695, %v875_v58  ;;  %v878_v8 = vpop.f32.mrb[38].mxu0  ;;  %v1809_v9 = vpop.eup %1808  ;;  %v1113_v10 = vadd.f32 0.5, %v1081_v60  ;;  %1241 = vst [vmem:[%s2545_s11 + $0x70] sm:$0xff] %v1807_v3  ;;  %1828 = vtanh.f32 %v1024_v61  ;;  %v720_v11 = vadd.f32 %v719_v6, %v2460_v32 }
 0x1aa   : > { %v879_v12 = vadd.f32 %v878_v8, %v2466_v37  ;;  %v880_v13 = vpop.f32.mrb[39].mxu0  ;;  %v1811_v15 = vpop.eup %1810  ;;  %v1114_v17 = vadd.f32 0.5, %v1082_v4  ;;  %1242 = vst [vmem:[%s2545_s11 + $0x78] sm:$0xff] %v1809_v9  ;;  %v1025_v18 = vmul.f32 0.5, %v718_v5  ;;  %1830 = vpow2.f32 %v1203_v1 }
 0x1ab   : > { %v881_v19 = vadd.f32 %v880_v13, %v2470_v40  ;;  %v1813_v20 = vpop.eup %1812  ;;  %1145 = vst [vmem:[%s2553_s12 + $0x70] sm:$0xff] %v1113_v10  ;;  %v1083_v21 = vmul.f32 0.5, %v1811_v15  ;;  %v1026_v22 = vmul.f32 0.5, %v720_v11  ;;  %1832 = vpow2.f32 %v1205_v7  ;;  %v723_v23 = vpop.f32.mrb[40].mxu1 }
 0x1ac   : > { %v1207_v24 = vmul.f32 1.442695, %v879_v12  ;;  %v1815_v26 = vpop.eup %1814  ;;  %1146 = vst [vmem:[%s2553_s12 + $0x78] sm:$0xff] %v1114_v17  ;;  %v1084_v27 = vmul.f32 0.5, %v1813_v20  ;;  %1834 = vtanh.f32 %v1025_v18  ;;  %v724_v29 = vadd.f32 %v723_v23, %v2454_v25  ;;  %v725_v31 = vpop.f32.mrb[41].mxu1 }
 0x1ad   : > { %v1209_v2 = vmul.f32 1.442695, %v881_v19  ;;  %v884_v33 = vpop.f32.mrb[40].mxu0  ;;  %v1817_v34 = vpop.eup %1816  ;;  %v1115_v35 = vadd.f32 0.5, %v1083_v21  ;;  %1243 = vst [vmem:[%s2545_s11 + $0x80] sm:$0xff] %v1815_v26  ;;  %1836 = vtanh.f32 %v1026_v22  ;;  %v726_v36 = vadd.f32 %v725_v31, %v2460_v32 }
 0x1ae   : > { %v885_v38 = vadd.f32 %v884_v33, %v2466_v37  ;;  %v886_v39 = vpop.f32.mrb[41].mxu0  ;;  %v1819_v30 = vpop.eup %1818  ;;  %v1116_v63 = vadd.f32 0.5, %v1084_v27  ;;  %1244 = vst [vmem:[%s2545_s11 + $0x88] sm:$0xff] %v1817_v34  ;;  %v1027_v14 = vmul.f32 0.5, %v724_v29  ;;  %1838 = vpow2.f32 %v1207_v24 }
 0x1af   : > { %v887_v28 = vadd.f32 %v886_v39, %v2470_v40  ;;  %v1821_v41 = vpop.eup %1820  ;;  %1147 = vst [vmem:[%s2553_s12 + $0x80] sm:$0xff] %v1115_v35  ;;  %v1085_v0 = vmul.f32 0.5, %v1819_v30  ;;  %v1028_v42 = vmul.f32 0.5, %v726_v36  ;;  %1840 = vpow2.f32 %v1209_v2  ;;  %v729_v43 = vpop.f32.mrb[42].mxu1 }
 0x1b0   : > { %v1211_v44 = vmul.f32 1.442695, %v885_v38  ;;  %v1823_v45 = vpop.eup %1822  ;;  %1148 = vst [vmem:[%s2553_s12 + $0x88] sm:$0xff] %v1116_v63  ;;  %v1086_v16 = vmul.f32 0.5, %v1821_v41  ;;  %1842 = vtanh.f32 %v1027_v14  ;;  %v730_v46 = vadd.f32 %v729_v43, %v2454_v25  ;;  %v731_v47 = vpop.f32.mrb[43].mxu1 }
 0x1b1   : > { %v1213_v48 = vmul.f32 1.442695, %v887_v28  ;;  %v890_v49 = vpop.f32.mrb[42].mxu0  ;;  %v1825_v50 = vpop.eup %1824  ;;  %v1117_v51 = vadd.f32 0.5, %v1085_v0  ;;  %1245 = vst [vmem:[%s2545_s11 + $0x90] sm:$0xff] %v1823_v45  ;;  %1844 = vtanh.f32 %v1028_v42  ;;  %v732_v52 = vadd.f32 %v731_v47, %v2460_v32 }
 0x1b2   : > { %v891_v53 = vadd.f32 %v890_v49, %v2466_v37  ;;  %v892_v54 = vpop.f32.mrb[43].mxu0  ;;  %v1827_v55 = vpop.eup %1826  ;;  %v1118_v56 = vadd.f32 0.5, %v1086_v16  ;;  %1246 = vst [vmem:[%s2545_s11 + $0x98] sm:$0xff] %v1825_v50  ;;  %v1029_v57 = vmul.f32 0.5, %v730_v46  ;;  %1846 = vpow2.f32 %v1211_v44 }
 0x1b3   : > { %v893_v58 = vadd.f32 %v892_v54, %v2470_v40  ;;  %v1829_v59 = vpop.eup %1828  ;;  %1149 = vst [vmem:[%s2553_s12 + $0x90] sm:$0xff] %v1117_v51  ;;  %v1087_v60 = vmul.f32 0.5, %v1827_v55  ;;  %v1030_v61 = vmul.f32 0.5, %v732_v52  ;;  %1848 = vpow2.f32 %v1213_v48  ;;  %v735_v62 = vpop.f32.mrb[44].mxu1 }
 0x1b4   : > { %v1215_v1 = vmul.f32 1.442695, %v891_v53  ;;  %v1831_v3 = vpop.eup %1830  ;;  %1150 = vst [vmem:[%s2553_s12 + $0x98] sm:$0xff] %v1118_v56  ;;  %v1088_v4 = vmul.f32 0.5, %v1829_v59  ;;  %1850 = vtanh.f32 %v1029_v57  ;;  %v736_v5 = vadd.f32 %v735_v62, %v2454_v25  ;;  %v737_v6 = vpop.f32.mrb[45].mxu1 }
 0x1b5   : > { %v1217_v7 = vmul.f32 1.442695, %v893_v58  ;;  %v896_v8 = vpop.f32.mrb[44].mxu0  ;;  %v1833_v9 = vpop.eup %1832  ;;  %v1119_v10 = vadd.f32 0.5, %v1087_v60  ;;  %1247 = vst [vmem:[%s2545_s11 + $0xa0] sm:$0xff] %v1831_v3  ;;  %1852 = vtanh.f32 %v1030_v61  ;;  %v738_v11 = vadd.f32 %v737_v6, %v2460_v32 }
 0x1b6   : > { %v897_v12 = vadd.f32 %v896_v8, %v2466_v37  ;;  %v898_v13 = vpop.f32.mrb[45].mxu0  ;;  %v1835_v15 = vpop.eup %1834  ;;  %v1120_v17 = vadd.f32 0.5, %v1088_v4  ;;  %1248 = vst [vmem:[%s2545_s11 + $0xa8] sm:$0xff] %v1833_v9  ;;  %v1031_v18 = vmul.f32 0.5, %v736_v5  ;;  %1854 = vpow2.f32 %v1215_v1 }
 0x1b7   : > { %v899_v19 = vadd.f32 %v898_v13, %v2470_v40  ;;  %v1837_v20 = vpop.eup %1836  ;;  %1151 = vst [vmem:[%s2553_s12 + $0xa0] sm:$0xff] %v1119_v10  ;;  %v1089_v21 = vmul.f32 0.5, %v1835_v15  ;;  %v1032_v22 = vmul.f32 0.5, %v738_v11  ;;  %1856 = vpow2.f32 %v1217_v7  ;;  %v741_v23 = vpop.f32.mrb[46].mxu1 }
 0x1b8   : > { %v1219_v24 = vmul.f32 1.442695, %v897_v12  ;;  %v1839_v26 = vpop.eup %1838  ;;  %1152 = vst [vmem:[%s2553_s12 + $0xa8] sm:$0xff] %v1120_v17  ;;  %v1090_v27 = vmul.f32 0.5, %v1837_v20  ;;  %1858 = vtanh.f32 %v1031_v18  ;;  %v742_v29 = vadd.f32 %v741_v23, %v2454_v25  ;;  %v743_v31 = vpop.f32.mrb[47].mxu1 }
 0x1b9   : > { %v1221_v2 = vmul.f32 1.442695, %v899_v19  ;;  %v902_v33 = vpop.f32.mrb[46].mxu0  ;;  %v1841_v34 = vpop.eup %1840  ;;  %v1121_v35 = vadd.f32 0.5, %v1089_v21  ;;  %1249 = vst [vmem:[%s2545_s11 + $0xb0] sm:$0xff] %v1839_v26  ;;  %1860 = vtanh.f32 %v1032_v22  ;;  %v744_v36 = vadd.f32 %v743_v31, %v2460_v32 }
 0x1ba   : > { %v903_v38 = vadd.f32 %v902_v33, %v2466_v37  ;;  %v904_v39 = vpop.f32.mrb[47].mxu0  ;;  %v1843_v30 = vpop.eup %1842  ;;  %v1122_v63 = vadd.f32 0.5, %v1090_v27  ;;  %1250 = vst [vmem:[%s2545_s11 + $0xb8] sm:$0xff] %v1841_v34  ;;  %v1033_v14 = vmul.f32 0.5, %v742_v29  ;;  %1862 = vpow2.f32 %v1219_v24 }
 0x1bb   : > { %v905_v25 = vadd.f32 %v904_v39, %v2470_v40  ;;  %v1845_v28 = vpop.eup %1844  ;;  %1153 = vst [vmem:[%s2553_s12 + $0xb0] sm:$0xff] %v1121_v35  ;;  %v1091_v41 = vmul.f32 0.5, %v1843_v30  ;;  %v1034_v0 = vmul.f32 0.5, %v744_v36  ;;  %1864 = vpow2.f32 %v1221_v2 }
 0x1bc   : > { %v1223_v32 = vmul.f32 1.442695, %v903_v38  ;;  %v1847_v42 = vpop.eup %1846  ;;  %1154 = vst [vmem:[%s2553_s12 + $0xb8] sm:$0xff] %v1122_v63  ;;  %v1092_v37 = vmul.f32 0.5, %v1845_v28  ;;  %1866 = vtanh.f32 %v1033_v14 }
 0x1bd   : > { %v1225_v43 = vmul.f32 1.442695, %v905_v25  ;;  %v1849_v44 = vpop.eup %1848  ;;  %v1123_v45 = vadd.f32 0.5, %v1091_v41  ;;  %1251 = vst [vmem:[%s2545_s11 + $0xc0] sm:$0xff] %v1847_v42  ;;  %1868 = vtanh.f32 %v1034_v0 }
 0x1be   : > { %v1851_v40 = vpop.eup %1850  ;;  %v1124_v16 = vadd.f32 0.5, %v1092_v37  ;;  %1252 = vst [vmem:[%s2545_s11 + $0xc8] sm:$0xff] %v1849_v44  ;;  %1870 = vpow2.f32 %v1223_v32 }
 0x1bf   : > { %v1853_v46 = vpop.eup %1852  ;;  %1155 = vst [vmem:[%s2553_s12 + $0xc0] sm:$0xff] %v1123_v45  ;;  %v1093_v47 = vmul.f32 0.5, %v1851_v40  ;;  %1872 = vpow2.f32 %v1225_v43 }
 0x1c0   : > { %v1855_v48 = vpop.eup %1854  ;;  %1156 = vst [vmem:[%s2553_s12 + $0xc8] sm:$0xff] %v1124_v16  ;;  %v1094_v49 = vmul.f32 0.5, %v1853_v46 }
 0x1c1   : > { %v1857_v50 = vpop.eup %1856  ;;  %v1125_v51 = vadd.f32 0.5, %v1093_v47  ;;  %1253 = vst [vmem:[%s2545_s11 + $0xd0] sm:$0xff] %v1855_v48 }
 0x1c2   : > { %v1859_v52 = vpop.eup %1858  ;;  %v1126_v53 = vadd.f32 0.5, %v1094_v49  ;;  %1254 = vst [vmem:[%s2545_s11 + $0xd8] sm:$0xff] %v1857_v50 }
 0x1c3   : > { %v1861_v54 = vpop.eup %1860  ;;  %1157 = vst [vmem:[%s2553_s12 + $0xd0] sm:$0xff] %v1125_v51  ;;  %v1095_v55 = vmul.f32 0.5, %v1859_v52 }
 0x1c4   : > { %v1863_v56 = vpop.eup %1862  ;;  %1158 = vst [vmem:[%s2553_s12 + $0xd8] sm:$0xff] %v1126_v53  ;;  %v1096_v57 = vmul.f32 0.5, %v1861_v54 }
 0x1c5   : > { %v1865_v58 = vpop.eup %1864  ;;  %v1127_v59 = vadd.f32 0.5, %v1095_v55  ;;  %1255 = vst [vmem:[%s2545_s11 + $0xe0] sm:$0xff] %v1863_v56 }
 0x1c6   : > { %v1867_v60 = vpop.eup %1866  ;;  %v1128_v61 = vadd.f32 0.5, %v1096_v57  ;;  %1256 = vst [vmem:[%s2545_s11 + $0xe8] sm:$0xff] %v1865_v58 }
 0x1c7   : > { %v1869_v62 = vpop.eup %1868  ;;  %1159 = vst [vmem:[%s2553_s12 + $0xe0] sm:$0xff] %v1127_v59  ;;  %v1097_v1 = vmul.f32 0.5, %v1867_v60 }
 0x1c8   : > { %v1871_v3 = vpop.eup %1870  ;;  %1160 = vst [vmem:[%s2553_s12 + $0xe8] sm:$0xff] %v1128_v61  ;;  %v1098_v4 = vmul.f32 0.5, %v1869_v62 }
 0x1c9   : > { %v1873_v5 = vpop.eup %1872  ;;  %v1129_v6 = vadd.f32 0.5, %v1097_v1  ;;  %1257 = vst [vmem:[%s2545_s11 + $0xf0] sm:$0xff] %v1871_v3 }
 0x1ca   : > { %v1130_v7 = vadd.f32 0.5, %v1098_v4  ;;  %1258 = vst [vmem:[%s2545_s11 + $0xf8] sm:$0xff] %v1873_v5  ;;  %s2074_s11 = smov [#allocation8]  }
 0x1cb   : > { %1161 = vst [vmem:[%s2553_s12 + $0xf0] sm:$0xff] %v1129_v6  ;;  %s1964_s17 = sshll.u32 %s2074_s11, 4  ;;  %s1965_s17 = int_to_ptr.vmem [resolvable:$false] %s1964_s17 }
 0x1cc   : > { %1162 = vst [vmem:[%s2553_s12 + $0xf8] sm:$0xff] %v1130_v7  ;;  %s1966_s24 = scalar_lea.vmem %s1965_s17, 8192  ;;  %p1967_p7 = scmp.lt.s32.totalorder %s2668_s16, %s1965_s17 }
 0x1cd   : > { %p1968_p9 = scmp.lt.s32.totalorder %s1966_s24, %s1960_s13 }
 0x1cf   : > { %p1969_p11 = por %p1968_p9, %p1967_p7 }
 0x1d1   : > { %p1970_p0 = pnand %p1969_p11, %p1963_p3 }
 0x1d3   : > { %1973 = shalt.err (!%p1970_p0)
}
 0x1d4   : > { %s1974_s7 = scalar_lea.hbm %s2666_s22, 4096  ;;  %s1978_s26 = scalar_lea.hbm %s2755_s4, 16384 }
 0x1d5   : > { %p1975_p5 = scmp.ne.s32.totalorder %s2666_s22, %s1974_s7  ;;  %p1979_p1 = scmp.lt.u32.totalorder %s2666_s22, %s2755_s4 }
 0x1d6   : > { %p1980_p4 = scmp.lt.u32.totalorder %s1978_s26, %s1974_s7  ;;  %p1982_p8 = scmp.lt.u32.totalorder %s1974_s7, %s2666_s22 }
 0x1d7   : > { %p1976_p10 = pnand %p1975_p5, %p2191_p12 }
 0x1d8   : > { %p1981_p6 = por %p1980_p4, %p1979_p1 }
 0x1d9   : > { %p1977_p2 = pneg %p1976_p10 }
 0x1da   : > { %p1983_p13 = por %p1982_p8, %p1981_p6 }
 0x1dc   : > { %p1984_p3 = pnand %p1983_p13, %p1977_p2 }
 0x1de   : > { %1987 = shalt.err (!%p1984_p3)
}
 0x1df   : > { %1615 = dma.vmem_to_hbm [thread:$0]  (%p2191_p12), %s2668_s16, 4096, %s2666_s22, %s2680_s28, %s2072_s8, %s2072_s8, %s2073_s29  }
 0x1e0   : > { %s1988_s13 = scalar_lea.vmem %s2677_s27, 4096  ;;  %s2075_s17 = smov [#allocation10]  }
 0x1e1   : > { %p1989_p7 = scmp.ne.s32.totalorder %s2677_s27, %s1988_s13  ;;  %s1992_s24 = sshll.u32 %s2075_s17, 4  ;;  %s1993_s24 = int_to_ptr.vmem [resolvable:$false] %s1992_s24 }
 0x1e2   : > { %s1994_s7 = scalar_lea.vmem %s1993_s24, 8192  ;;  %p1995_p0 = scmp.lt.s32.totalorder %s2677_s27, %s1993_s24 }
 0x1e3   : > { %p1990_p9 = pnand %p1989_p7, %p2191_p12  ;;  %p1996_p5 = scmp.lt.s32.totalorder %s1994_s7, %s1988_s13 }
 0x1e5   : > { %p1991_p11 = pneg %p1990_p9  ;;  %p1997_p10 = por %p1996_p5, %p1995_p0 }
 0x1e7   : > { %p1998_p2 = pnand %p1997_p10, %p1991_p11 }
 0x1e9   : > { %2001 = shalt.err (!%p1998_p2)
}
 0x1ea   : > { %s2002_s16 = scalar_lea.hbm %s2675_s14, 4096  ;;  %s2006_s15 = scalar_lea.hbm %s2756_s5, 16384 }
 0x1eb   : > { %p2003_p1 = scmp.ne.s32.totalorder %s2675_s14, %s2002_s16  ;;  %p2007_p8 = scmp.lt.u32.totalorder %s2675_s14, %s2756_s5 }
 0x1ec   : > { %p2008_p13 = scmp.lt.u32.totalorder %s2006_s15, %s2002_s16  ;;  %p2010_p7 = scmp.lt.u32.totalorder %s2002_s16, %s2675_s14 }
 0x1ed   : > { %p2004_p4 = pnand %p2003_p1, %p2191_p12 }
 0x1ee   : > { %p2009_p3 = por %p2008_p13, %p2007_p8 }
 0x1ef   : > { %p2005_p6 = pneg %p2004_p4 }
 0x1f0   : > { %p2011_p9 = por %p2010_p7, %p2009_p3 }
 0x1f2   : > { %p2012_p11 = pnand %p2011_p9, %p2005_p6 }
 0x1f4   : > { %2015 = shalt.err (!%p2012_p11)
}
 0x1f5   : > { %1616 = dma.vmem_to_hbm [thread:$0]  (%p2191_p12), %s2677_s27, 4096, %s2675_s14, %s2680_s28, %s2072_s8, %s2072_s8, %s2073_s29  }
 0x1f6 PF: > { %p1641_p0 = scmp.ge.s32.totalorder %s2062_s21, 2  ;;  %s1333_s11 = sand.u32 1, %s2050_s18  }
 0x1f7   : > { %p2771_p5 = scmp.ne.s32.totalorder %s2761_s25, 0  ;;  %s1334_s13 = scalar_lea.sflag [#allocation4], %s1333_s11 }
 0x1f9   : > { %p1629_p10 = pnand %p1641_p0, %p2771_p5 }
 0x1fb   : > { %2041 = dma.done.wait (!%p1629_p10), %s1334_s13, 4096  }
 0x1fc   : > { %2043 = vsyncadd (!%p1629_p10), %s1334_s13, 4294963200  ;;  %s1342_s10 = sand.u32 1, %s1462_s23  }
 0x1fd   : > { %s1343_s17 = scalar_lea.sflag [#allocation9], %s1342_s10 }
 0x1fe   : > { %2045 = dma.done.wait (!%p1629_p10), %s1343_s17, 8192  }
 0x1ff   : > { %2047 = vsyncadd (!%p1629_p10), %s1343_s17, 4294959104  ;;  %p23_p12 = scmp.ge.s32.totalorder %s2161_s30, 6   ;;  %s2772_s18 = smov %s2054_s19 }
 0x200   : > { %s2773_s19 = smov %s2058_s20  ;;  %s2774_s20 = smov %s2187_s9 }
 0x201   : > { %s2775_s21 = smov %s2161_s30  ;;  %25 = sbr.rel (!%p23_p12) target bundleno = 8 (0x8), region = 113 }
 0x208   :  { %1357 = vsyncpa [#allocation3], 1 }
 0x209   :  { %1359 = vsyncpa [#allocation3 + $0x1], 1 }
 0x20a   :  { %1360 = vsyncpa [#allocation6], 1 }
 0x20b   :  { %1361 = vsyncpa [#allocation4], 1 }
 0x20c   :  { %1363 = vsyncpa [#allocation4 + $0x1], 1 }
 0x20d   :  { %1364 = vsyncpa [#allocation9], 1 }
 0x20e   :  { %1366 = vsyncpa [#allocation9 + $0x1], 1 }

</bundles_post_ra>
